<compile_context>
chip_gen: v7x
topology: tpu7x:2x2x1
jax: 0.10.0
libtpu: 0.0.40
codegen_flags: <defaults>
</compile_context>

<pallas_src>
import functools

import jax
import jax.numpy as jnp
from jax import lax
from jax.experimental import pallas as pl
from jax.experimental.pallas import tpu as pltpu


# ------------------------------ fused kernel --------------------------------

def _spacetime_kernel(x_ref, wqkv_ref, w0_ref, o_ref, *, heads, dim_head,
                      scale, classification, groups, group_size, space_att):
    """One batch element per grid step. x_ref: [1,T,dim], o_ref: [1,T,dim]."""
    _, T, _ = o_ref.shape
    H, d = heads, dim_head
    Hd = H * d
    G, gs = groups, group_size
    f32 = jnp.float32

    x = x_ref[0].astype(f32)                                        # [T, dim]
    # QKV projection; columns are (q|k|v), per-head contiguous, d fastest
    # (W_qkv was permuted once at param-prep time -> no 5-D qkv transpose).
    qkv = jnp.dot(x, wqkv_ref[...].astype(f32),
                  preferred_element_type=f32)                       # [T, 3*Hd]

    def to_groups(t):   # [n, d] -> [G, gs, d]   (token order is frame-major)
        if space_att:   # groups = frames: contiguous token ranges
            return t.reshape(G, gs, d)
        # groups = patches: tokens of a group are strided by `groups`
        return jnp.transpose(t.reshape(gs, G, d), (1, 0, 2))

    def from_groups(t):  # [G, gs, d] -> [n, d] in original token order
        if space_att:
            return t.reshape(G * gs, d)
        return jnp.transpose(t, (1, 0, 2)).reshape(G * gs, d)

    head_outs = []
    # TODO(synk): at real head counts (H=12, d=64) switch to
    # lax.fori_loop(..., unroll=True) writing per-head columns into a VMEM
    # scratch slab to bound live ranges; H=4 toy unroll is fine.
    for h in range(H):
        q_h = qkv[:, h * d:(h + 1) * d]                             # [T, d]
        k_h = qkv[:, Hd + h * d:Hd + (h + 1) * d]                   # [T, d]
        v_h = qkv[:, 2 * Hd + h * d:2 * Hd + (h + 1) * d]           # [T, d]

        if classification:
            # --- CLS query attends ALL tokens (space AND time) ---
            s_cls = lax.dot_general(q_h[0:1], k_h, (((1,), (1,)), ((), ())),
                                    preferred_element_type=f32) * scale   # [1,T]
            p_cls = jnp.exp(s_cls - jnp.max(s_cls, axis=-1, keepdims=True))
            p_cls = p_cls / jnp.sum(p_cls, axis=-1, keepdims=True)
            cls_out = jnp.dot(p_cls, v_h, preferred_element_type=f32)     # [1,d]

            # --- divided attention, group-tiled: each non-CLS token attends
            # its own group (same frame for space-att / same patch for
            # time-att) plus the CLS key/value.  The CLS contribution is an
            # extra in-kernel score column + rank-1 value update. ---
            q3g = to_groups(q_h[1:])                                # [G,gs,d]
            k3g = to_groups(k_h[1:])
            v3g = to_groups(v_h[1:])
            s_loc = jnp.einsum('gqd,gkd->gqk', q3g, k3g,
                               preferred_element_type=f32) * scale  # [G,gs,gs]
            cls_k = k_h[0:1, :][None]                               # [1,1,d]
            cls_v = v_h[0:1, :][None]                               # [1,1,d]
            s_c = jnp.sum(q3g * cls_k, axis=-1,
                          keepdims=True) * scale                    # [G,gs,1]
            m = jnp.maximum(jnp.max(s_loc, axis=-1, keepdims=True), s_c)
            e_loc = jnp.exp(s_loc - m)
            e_c = jnp.exp(s_c - m)
            inv = 1.0 / (e_c + jnp.sum(e_loc, axis=-1, keepdims=True))
            tok_g = (e_c * inv) * cls_v + jnp.einsum(
                'gqk,gkd->gqd', e_loc * inv, v3g,
                preferred_element_type=f32)                         # [G,gs,d]
            head_outs.append(
                jnp.concatenate([cls_out, from_groups(tok_g)], axis=0))  # [T,d]
        else:
            # compute_mhsa default scale_factor = 1 (matches the PyTorch module).
            s = lax.dot_general(q_h, k_h, (((1,), (1,)), ((), ())),
                                preferred_element_type=f32)         # [T, T]
            p = jnp.exp(s - jnp.max(s, axis=-1, keepdims=True))
            p = p / jnp.sum(p, axis=-1, keepdims=True)
            head_outs.append(jnp.dot(p, v_h, preferred_element_type=f32))

    # One fused [T, Hd] @ [Hd, dim] output projection, one full-block store.
    slab = jnp.concatenate(head_outs, axis=-1)                      # [T, Hd]
    o_ref[0] = jnp.dot(slab, w0_ref[...].astype(f32),
                       preferred_element_type=f32).astype(o_ref.dtype)


def prepare_spacetime_params(params, *, heads, dim_head):
    """One-time (param-init) weight prep.

    Permutes W_qkv columns from the PyTorch '(d k h)' feature order to
    '(k h d)' so q/k/v and per-head slices are contiguous column ranges of
    the in-kernel projection output (numerically identical)."""
    W_qkv, W_0 = params["W_qkv"], params["W_0"]
    dim = W_qkv.shape[0]
    W_qkv_perm = (W_qkv.reshape(dim, dim_head, 3, heads)
                        .transpose(0, 2, 3, 1)
                        .reshape(dim, 3 * heads * dim_head))
    return {"W_qkv_perm": W_qkv_perm, "W_0": W_0}


def spacetime_mhsa_forward_pallas(x, prepared, *, heads, dim_head,
                                  tokens_to_attend, space_att,
                                  classification=True):
    """Fused forward. x: [batch, 1 + frames*patches, dim] (CLS first)."""
    W_qkv_perm, W_0 = prepared["W_qkv_perm"], prepared["W_0"]
    batch, tokens, dim = x.shape
    Hd = heads * dim_head
    scale = dim_head ** (-0.5)

    if classification:
        n = tokens - 1
        group_size = tokens_to_attend           # patches (space) / frames (time)
        groups = max(n // group_size, 1)        # frames (space) / patches (time)
    else:
        groups, group_size = 1, tokens          # unused by the kernel branch

    # TODO(synk): linear_spatial_attention (Linformer E projection) not implemented.
    # TODO(synk): at real TimeSformer sizes add a token-tile grid axis and mark
    # the constant-index weight BlockSpecs pipeline_mode=pl.Buffered(1).

    kernel = functools.partial(_spacetime_kernel, heads=heads,
                               dim_head=dim_head, scale=scale,
                               classification=classification,
                               groups=groups, group_size=group_size,
                               space_att=space_att)
    return pl.pallas_call(
        kernel,
        out_shape=jax.ShapeDtypeStruct((batch, tokens, dim), x.dtype),
        grid=(batch,),
        in_specs=[
            pl.BlockSpec((1, tokens, dim), lambda b: (b, 0, 0)),
            pl.BlockSpec((dim, 3 * Hd), lambda b: (0, 0)),
            pl.BlockSpec((Hd, dim), lambda b: (0, 0)),
        ],
        out_specs=pl.BlockSpec((1, tokens, dim), lambda b: (b, 0, 0)),
        compiler_params=pltpu.CompilerParams(
            dimension_semantics=("parallel",)),
    )(x, W_qkv_perm, W_0)


# -------------------- pure-JAX reference (mirrors PyTorch) ------------------

def _mhsa_ref(q, k, v, scale):
    s = jnp.einsum("bhid,bhjd->bhij", q, k) * scale
    a = jax.nn.softmax(s, axis=-1)
    return jnp.einsum("bhij,bhjd->bhid", a, v)


def spacetime_mhsa_forward_ref(x, params, *, heads, dim_head, tokens_to_attend,
                               space_att, classification=True):
    W_qkv, W_0 = params["W_qkv"], params["W_0"]
    batch, tokens, dim = x.shape
    scale = dim_head ** (-0.5)

    qkv = jnp.dot(x.reshape(batch * tokens, dim), W_qkv).reshape(batch, tokens, -1)
    qkv = qkv.reshape(batch, tokens, dim_head, 3, heads)
    qkv = jnp.transpose(qkv, (3, 0, 4, 1, 2))            # [3, b, h, t, d]
    q, k, v = qkv[0], qkv[1], qkv[2]

    if classification:
        cls_q, q3 = q[:, :, :1], q[:, :, 1:]
        out_cls = _mhsa_ref(cls_q, k, v, scale)           # [b, h, 1, d]
        cls_k, k3 = k[:, :, :1], k[:, :, 1:]
        cls_v, v3 = v[:, :, :1], v[:, :, 1:]

        def reshape_timespace(t):
            b, h, fp, d = t.shape
            if space_att:   # 'b h (f p) d -> (b f) h p d'
                p = tokens_to_attend
                f = fp // p
                t = t.reshape(b, h, f, p, d)
                return jnp.transpose(t, (0, 2, 1, 3, 4)).reshape(b * f, h, p, d)
            else:           # 'b h (f p) d -> (b p) h f d'
                f = tokens_to_attend
                p = fp // f
                t = t.reshape(b, h, f, p, d)
                return jnp.transpose(t, (0, 3, 1, 2, 4)).reshape(b * p, h, f, d)

        q_sep, k_sep, v_sep = map(reshape_timespace, (q3, k3, v3))
        tile = q_sep.shape[0] // batch
        k_cat = jnp.concatenate([jnp.repeat(cls_k, tile, axis=0), k_sep], axis=2)
        v_cat = jnp.concatenate([jnp.repeat(cls_v, tile, axis=0), v_sep], axis=2)

        out_mhsa = _mhsa_ref(q_sep, k_cat, v_cat, scale)
        bk, h, t, d = out_mhsa.shape
        g = bk // batch
        out_mhsa = out_mhsa.reshape(batch, g, h, t, d)
        if space_att:
            out_mhsa = jnp.transpose(out_mhsa, (0, 2, 1, 3, 4)).reshape(
                batch, h, g * t, d)
        else:
            out_mhsa = jnp.transpose(out_mhsa, (0, 2, 3, 1, 4)).reshape(
                batch, h, t * g, d)
        out = jnp.concatenate([out_cls, out_mhsa], axis=2)
    else:
        out = _mhsa_ref(q, k, v, 1.0)

    out = jnp.transpose(out, (0, 2, 1, 3)).reshape(batch, tokens, heads * dim_head)
    out = jnp.dot(out.reshape(batch * tokens, heads * dim_head), W_0)
    return out.reshape(batch, tokens, dim)


# --------------------------------- main --------------------------------------

if __name__ == "__main__":
    batch, dim, heads = 2, 32, 4
    dim_head = dim // heads
    frames, patches = 2, 4
    tokens = 1 + frames * patches            # 1 CLS + spacetime tokens
    _dim = dim_head * heads

    key = jax.random.PRNGKey(0)
    kx, kq, kw = jax.random.split(key, 3)
    x = jax.random.normal(kx, (batch, tokens, dim), dtype=jnp.float32)
    params = {
        # nn.Linear(dim, 3*_dim, bias=False): stored already transposed (x @ W)
        "W_qkv": jax.random.normal(kq, (dim, 3 * _dim), dtype=jnp.float32) * 0.05,
        # nn.Linear(_dim, dim, bias=False)
        "W_0": jax.random.normal(kw, (_dim, dim), dtype=jnp.float32) * 0.05,
    }
    prepared = prepare_spacetime_params(params, heads=heads, dim_head=dim_head)

    # Exercise space attention, time attention, and the no-CLS path.
    cases = [
        dict(space_att=True, tokens_to_attend=patches, classification=True),
        dict(space_att=False, tokens_to_attend=frames, classification=True),
        dict(space_att=True, tokens_to_attend=patches, classification=False),
    ]
    for cfg in cases:
        out = jax.block_until_ready(spacetime_mhsa_forward_pallas(
            x, prepared, heads=heads, dim_head=dim_head, **cfg))
        ref = jax.block_until_ready(spacetime_mhsa_forward_ref(
            x, params, heads=heads, dim_head=dim_head, **cfg))
        assert out.shape == (batch, tokens, dim), out.shape
        err = float(jnp.max(jnp.abs(out - ref)))
        assert jnp.allclose(out, ref, atol=1e-4, rtol=1e-4), (cfg, err)

    print("KERNEL_OK")
</pallas_src>

<mosaic_0001>
module attributes {stable_mosaic.version = 11 : i64} {
  func.func @_spacetime_kernel(%arg0: i32, %arg1: memref<1x9x32xf32, #tpu.memory_space<vmem>>, %arg2: memref<32x96xf32, #tpu.memory_space<vmem>>, %arg3: memref<32x32xf32, #tpu.memory_space<vmem>>, %arg4: memref<1x9x32xf32, #tpu.memory_space<vmem>>) attributes {dimension_semantics = [#tpu.dimension_semantics<parallel>], iteration_bounds = array<i64: 2>, scalar_prefetch = 0 : i64, scratch_operands = 0 : i64, tpu.core_type = #tpu.core_type<tc>, window_params = [{transform_indices = @transform_0, window_bounds = array<i64: 1, 9, 32>}, {pipeline_mode = #tpu.pipeline_mode<synchronous>, transform_indices = @transform_1, window_bounds = array<i64: 32, 96>}, {pipeline_mode = #tpu.pipeline_mode<synchronous>, transform_indices = @transform_2, window_bounds = array<i64: 32, 32>}, {transform_indices = @transform_3, window_bounds = array<i64: 1, 9, 32>}]} {
    %c0 = arith.constant 0 : index
    %c0_0 = arith.constant 0 : index
    %c0_1 = arith.constant 0 : index
    %0 = vector.load %arg1[%c0, %c0_0, %c0_1] : memref<1x9x32xf32, #tpu.memory_space<vmem>>, vector<1x9x32xf32>
    %1 = vector.shape_cast %0 : vector<1x9x32xf32> to vector<9x32xf32>
    %c0_2 = arith.constant 0 : index
    %c0_3 = arith.constant 0 : index
    %2 = vector.load %arg2[%c0_2, %c0_3] : memref<32x96xf32, #tpu.memory_space<vmem>>, vector<32x96xf32>
    %cst = arith.constant dense<0.000000e+00> : vector<9x96xf32>
    %3 = tpu.matmul %1, %2, %cst {dimension_numbers = #tpu.dot_dimension_numbers<[1], [0], [0], [1], [0, 0, 1, 1], [], []>} : vector<9x32xf32>, vector<32x96xf32>, vector<9x96xf32> -> vector<9x96xf32>
    %4 = vector.extract_strided_slice %3 {offsets = [0, 0], sizes = [9, 8], strides = [1, 1]} : vector<9x96xf32> to vector<9x8xf32>
    %5 = vector.extract_strided_slice %3 {offsets = [0, 32], sizes = [9, 8], strides = [1, 1]} : vector<9x96xf32> to vector<9x8xf32>
    %6 = vector.extract_strided_slice %3 {offsets = [0, 64], sizes = [9, 8], strides = [1, 1]} : vector<9x96xf32> to vector<9x8xf32>
    %7 = vector.extract_strided_slice %4 {offsets = [0, 0], sizes = [1, 8], strides = [1, 1]} : vector<9x8xf32> to vector<1x8xf32>
    %cst_4 = arith.constant dense<0.000000e+00> : vector<1x9xf32>
    %8 = tpu.matmul %7, %5, %cst_4 {dimension_numbers = #tpu.dot_dimension_numbers<[1], [1], [0], [0], [0, 0, 1, 0], [], []>} : vector<1x8xf32>, vector<9x8xf32>, vector<1x9xf32> -> vector<1x9xf32>
    %cst_5 = arith.constant 0.353553385 : f32
    %9 = vector.broadcast %cst_5 : f32 to vector<1x9xf32>
    %10 = arith.mulf %8, %9 : vector<1x9xf32>
    %cst_6 = arith.constant dense<0xFF800000> : vector<1xf32>
    %11 = vector.multi_reduction <maximumf>, %10, %cst_6 [1] : vector<1x9xf32> to vector<1xf32>
    %12 = vector.shape_cast %11 : vector<1xf32> to vector<1x1xf32>
    %13 = vector.broadcast %12 : vector<1x1xf32> to vector<1x9xf32>
    %14 = arith.subf %10, %13 : vector<1x9xf32>
    %15 = math.exp %14 : vector<1x9xf32>
    %cst_7 = arith.constant dense<0.000000e+00> : vector<1xf32>
    %16 = vector.multi_reduction <add>, %15, %cst_7 [1] : vector<1x9xf32> to vector<1xf32>
    %17 = vector.shape_cast %16 : vector<1xf32> to vector<1x1xf32>
    %18 = vector.broadcast %17 : vector<1x1xf32> to vector<1x9xf32>
    %19 = arith.divf %15, %18 : vector<1x9xf32>
    %cst_8 = arith.constant dense<0.000000e+00> : vector<1x8xf32>
    %20 = tpu.matmul %19, %6, %cst_8 {dimension_numbers = #tpu.dot_dimension_numbers<[1], [0], [0], [1], [0, 0, 1, 1], [], []>} : vector<1x9xf32>, vector<9x8xf32>, vector<1x8xf32> -> vector<1x8xf32>
    %21 = vector.extract_strided_slice %4 {offsets = [1, 0], sizes = [8, 8], strides = [1, 1]} : vector<9x8xf32> to vector<8x8xf32>
    %22 = vector.shape_cast %21 : vector<8x8xf32> to vector<2x4x8xf32>
    %23 = vector.extract_strided_slice %5 {offsets = [1, 0], sizes = [8, 8], strides = [1, 1]} : vector<9x8xf32> to vector<8x8xf32>
    %24 = vector.shape_cast %23 : vector<8x8xf32> to vector<2x4x8xf32>
    %25 = vector.extract_strided_slice %6 {offsets = [1, 0], sizes = [8, 8], strides = [1, 1]} : vector<9x8xf32> to vector<8x8xf32>
    %26 = vector.shape_cast %25 : vector<8x8xf32> to vector<2x4x8xf32>
    "tpu.trace_start"() <{level = 10 : i32, message = "gqd,gkd->gqk"}> : () -> ()
    %cst_9 = arith.constant dense<0.000000e+00> : vector<2x4x4xf32>
    %27 = tpu.matmul %22, %24, %cst_9 {dimension_numbers = #tpu.dot_dimension_numbers<[2], [2], [1], [1], [0, 0, 0, 1, 1, 1], [0], [0]>} : vector<2x4x8xf32>, vector<2x4x8xf32>, vector<2x4x4xf32> -> vector<2x4x4xf32>
    "tpu.trace_stop"() : () -> ()
    %cst_10 = arith.constant 0.353553385 : f32
    %28 = vector.broadcast %cst_10 : f32 to vector<2x4x4xf32>
    %29 = arith.mulf %27, %28 : vector<2x4x4xf32>
    %30 = vector.extract_strided_slice %5 {offsets = [0, 0], sizes = [1, 8], strides = [1, 1]} : vector<9x8xf32> to vector<1x8xf32>
    %31 = vector.shape_cast %30 : vector<1x8xf32> to vector<1x1x8xf32>
    %32 = vector.extract_strided_slice %6 {offsets = [0, 0], sizes = [1, 8], strides = [1, 1]} : vector<9x8xf32> to vector<1x8xf32>
    %33 = vector.shape_cast %32 : vector<1x8xf32> to vector<1x1x8xf32>
    %34 = vector.broadcast %31 : vector<1x1x8xf32> to vector<2x4x8xf32>
    %35 = arith.mulf %22, %34 : vector<2x4x8xf32>
    %cst_11 = arith.constant dense<0.000000e+00> : vector<2x4xf32>
    %36 = vector.multi_reduction <add>, %35, %cst_11 [2] : vector<2x4x8xf32> to vector<2x4xf32>
    %37 = vector.shape_cast %36 : vector<2x4xf32> to vector<2x4x1xf32>
    %cst_12 = arith.constant 0.353553385 : f32
    %38 = vector.broadcast %cst_12 : f32 to vector<2x4x1xf32>
    %39 = arith.mulf %37, %38 : vector<2x4x1xf32>
    %cst_13 = arith.constant dense<0xFF800000> : vector<2x4xf32>
    %40 = vector.multi_reduction <maximumf>, %29, %cst_13 [2] : vector<2x4x4xf32> to vector<2x4xf32>
    %41 = vector.shape_cast %40 : vector<2x4xf32> to vector<2x4x1xf32>
    %42 = arith.maximumf %41, %39 : vector<2x4x1xf32>
    %43 = vector.broadcast %42 : vector<2x4x1xf32> to vector<2x4x4xf32>
    %44 = arith.subf %29, %43 : vector<2x4x4xf32>
    %45 = math.exp %44 : vector<2x4x4xf32>
    %46 = arith.subf %39, %42 : vector<2x4x1xf32>
    %47 = math.exp %46 : vector<2x4x1xf32>
    %cst_14 = arith.constant dense<0.000000e+00> : vector<2x4xf32>
    %48 = vector.multi_reduction <add>, %45, %cst_14 [2] : vector<2x4x4xf32> to vector<2x4xf32>
    %49 = vector.shape_cast %48 : vector<2x4xf32> to vector<2x4x1xf32>
    %50 = arith.addf %47, %49 : vector<2x4x1xf32>
    %cst_15 = arith.constant 1.000000e+00 : f32
    %51 = vector.broadcast %cst_15 : f32 to vector<2x4x1xf32>
    %52 = arith.divf %51, %50 : vector<2x4x1xf32>
    %53 = arith.mulf %47, %52 : vector<2x4x1xf32>
    %54 = vector.broadcast %53 : vector<2x4x1xf32> to vector<2x4x8xf32>
    %55 = vector.broadcast %33 : vector<1x1x8xf32> to vector<2x4x8xf32>
    %56 = arith.mulf %54, %55 : vector<2x4x8xf32>
    %57 = vector.broadcast %52 : vector<2x4x1xf32> to vector<2x4x4xf32>
    %58 = arith.mulf %45, %57 : vector<2x4x4xf32>
    "tpu.trace_start"() <{level = 10 : i32, message = "gqk,gkd->gqd"}> : () -> ()
    %cst_16 = arith.constant dense<0.000000e+00> : vector<2x4x8xf32>
    %59 = tpu.matmul %58, %26, %cst_16 {dimension_numbers = #tpu.dot_dimension_numbers<[2], [1], [1], [2], [0, 0, 0, 1, 1, 2], [0], [0]>} : vector<2x4x4xf32>, vector<2x4x8xf32>, vector<2x4x8xf32> -> vector<2x4x8xf32>
    "tpu.trace_stop"() : () -> ()
    %60 = arith.addf %56, %59 : vector<2x4x8xf32>
    %61 = vector.shape_cast %60 : vector<2x4x8xf32> to vector<8x8xf32>
    %62 = tpu.concatenate %20, %61 in 0 : vector<1x8xf32>, vector<8x8xf32> -> vector<9x8xf32>
    %63 = vector.extract_strided_slice %3 {offsets = [0, 8], sizes = [9, 8], strides = [1, 1]} : vector<9x96xf32> to vector<9x8xf32>
    %64 = vector.extract_strided_slice %3 {offsets = [0, 40], sizes = [9, 8], strides = [1, 1]} : vector<9x96xf32> to vector<9x8xf32>
    %65 = vector.extract_strided_slice %3 {offsets = [0, 72], sizes = [9, 8], strides = [1, 1]} : vector<9x96xf32> to vector<9x8xf32>
    %66 = vector.extract_strided_slice %63 {offsets = [0, 0], sizes = [1, 8], strides = [1, 1]} : vector<9x8xf32> to vector<1x8xf32>
    %cst_17 = arith.constant dense<0.000000e+00> : vector<1x9xf32>
    %67 = tpu.matmul %66, %64, %cst_17 {dimension_numbers = #tpu.dot_dimension_numbers<[1], [1], [0], [0], [0, 0, 1, 0], [], []>} : vector<1x8xf32>, vector<9x8xf32>, vector<1x9xf32> -> vector<1x9xf32>
    %cst_18 = arith.constant 0.353553385 : f32
    %68 = vector.broadcast %cst_18 : f32 to vector<1x9xf32>
    %69 = arith.mulf %67, %68 : vector<1x9xf32>
    %cst_19 = arith.constant dense<0xFF800000> : vector<1xf32>
    %70 = vector.multi_reduction <maximumf>, %69, %cst_19 [1] : vector<1x9xf32> to vector<1xf32>
    %71 = vector.shape_cast %70 : vector<1xf32> to vector<1x1xf32>
    %72 = vector.broadcast %71 : vector<1x1xf32> to vector<1x9xf32>
    %73 = arith.subf %69, %72 : vector<1x9xf32>
    %74 = math.exp %73 : vector<1x9xf32>
    %cst_20 = arith.constant dense<0.000000e+00> : vector<1xf32>
    %75 = vector.multi_reduction <add>, %74, %cst_20 [1] : vector<1x9xf32> to vector<1xf32>
    %76 = vector.shape_cast %75 : vector<1xf32> to vector<1x1xf32>
    %77 = vector.broadcast %76 : vector<1x1xf32> to vector<1x9xf32>
    %78 = arith.divf %74, %77 : vector<1x9xf32>
    %cst_21 = arith.constant dense<0.000000e+00> : vector<1x8xf32>
    %79 = tpu.matmul %78, %65, %cst_21 {dimension_numbers = #tpu.dot_dimension_numbers<[1], [0], [0], [1], [0, 0, 1, 1], [], []>} : vector<1x9xf32>, vector<9x8xf32>, vector<1x8xf32> -> vector<1x8xf32>
    %80 = vector.extract_strided_slice %63 {offsets = [1, 0], sizes = [8, 8], strides = [1, 1]} : vector<9x8xf32> to vector<8x8xf32>
    %81 = vector.shape_cast %80 : vector<8x8xf32> to vector<2x4x8xf32>
    %82 = vector.extract_strided_slice %64 {offsets = [1, 0], sizes = [8, 8], strides = [1, 1]} : vector<9x8xf32> to vector<8x8xf32>
    %83 = vector.shape_cast %82 : vector<8x8xf32> to vector<2x4x8xf32>
    %84 = vector.extract_strided_slice %65 {offsets = [1, 0], sizes = [8, 8], strides = [1, 1]} : vector<9x8xf32> to vector<8x8xf32>
    %85 = vector.shape_cast %84 : vector<8x8xf32> to vector<2x4x8xf32>
    "tpu.trace_start"() <{level = 10 : i32, message = "gqd,gkd->gqk"}> : () -> ()
    %cst_22 = arith.constant dense<0.000000e+00> : vector<2x4x4xf32>
    %86 = tpu.matmul %81, %83, %cst_22 {dimension_numbers = #tpu.dot_dimension_numbers<[2], [2], [1], [1], [0, 0, 0, 1, 1, 1], [0], [0]>} : vector<2x4x8xf32>, vector<2x4x8xf32>, vector<2x4x4xf32> -> vector<2x4x4xf32>
    "tpu.trace_stop"() : () -> ()
    %cst_23 = arith.constant 0.353553385 : f32
    %87 = vector.broadcast %cst_23 : f32 to vector<2x4x4xf32>
    %88 = arith.mulf %86, %87 : vector<2x4x4xf32>
    %89 = vector.extract_strided_slice %64 {offsets = [0, 0], sizes = [1, 8], strides = [1, 1]} : vector<9x8xf32> to vector<1x8xf32>
    %90 = vector.shape_cast %89 : vector<1x8xf32> to vector<1x1x8xf32>
    %91 = vector.extract_strided_slice %65 {offsets = [0, 0], sizes = [1, 8], strides = [1, 1]} : vector<9x8xf32> to vector<1x8xf32>
    %92 = vector.shape_cast %91 : vector<1x8xf32> to vector<1x1x8xf32>
    %93 = vector.broadcast %90 : vector<1x1x8xf32> to vector<2x4x8xf32>
    %94 = arith.mulf %81, %93 : vector<2x4x8xf32>
    %cst_24 = arith.constant dense<0.000000e+00> : vector<2x4xf32>
    %95 = vector.multi_reduction <add>, %94, %cst_24 [2] : vector<2x4x8xf32> to vector<2x4xf32>
    %96 = vector.shape_cast %95 : vector<2x4xf32> to vector<2x4x1xf32>
    %cst_25 = arith.constant 0.353553385 : f32
    %97 = vector.broadcast %cst_25 : f32 to vector<2x4x1xf32>
    %98 = arith.mulf %96, %97 : vector<2x4x1xf32>
    %cst_26 = arith.constant dense<0xFF800000> : vector<2x4xf32>
    %99 = vector.multi_reduction <maximumf>, %88, %cst_26 [2] : vector<2x4x4xf32> to vector<2x4xf32>
    %100 = vector.shape_cast %99 : vector<2x4xf32> to vector<2x4x1xf32>
    %101 = arith.maximumf %100, %98 : vector<2x4x1xf32>
    %102 = vector.broadcast %101 : vector<2x4x1xf32> to vector<2x4x4xf32>
    %103 = arith.subf %88, %102 : vector<2x4x4xf32>
    %104 = math.exp %103 : vector<2x4x4xf32>
    %105 = arith.subf %98, %101 : vector<2x4x1xf32>
    %106 = math.exp %105 : vector<2x4x1xf32>
    %cst_27 = arith.constant dense<0.000000e+00> : vector<2x4xf32>
    %107 = vector.multi_reduction <add>, %104, %cst_27 [2] : vector<2x4x4xf32> to vector<2x4xf32>
    %108 = vector.shape_cast %107 : vector<2x4xf32> to vector<2x4x1xf32>
    %109 = arith.addf %106, %108 : vector<2x4x1xf32>
    %cst_28 = arith.constant 1.000000e+00 : f32
    %110 = vector.broadcast %cst_28 : f32 to vector<2x4x1xf32>
    %111 = arith.divf %110, %109 : vector<2x4x1xf32>
    %112 = arith.mulf %106, %111 : vector<2x4x1xf32>
    %113 = vector.broadcast %112 : vector<2x4x1xf32> to vector<2x4x8xf32>
    %114 = vector.broadcast %92 : vector<1x1x8xf32> to vector<2x4x8xf32>
    %115 = arith.mulf %113, %114 : vector<2x4x8xf32>
    %116 = vector.broadcast %111 : vector<2x4x1xf32> to vector<2x4x4xf32>
    %117 = arith.mulf %104, %116 : vector<2x4x4xf32>
    "tpu.trace_start"() <{level = 10 : i32, message = "gqk,gkd->gqd"}> : () -> ()
    %cst_29 = arith.constant dense<0.000000e+00> : vector<2x4x8xf32>
    %118 = tpu.matmul %117, %85, %cst_29 {dimension_numbers = #tpu.dot_dimension_numbers<[2], [1], [1], [2], [0, 0, 0, 1, 1, 2], [0], [0]>} : vector<2x4x4xf32>, vector<2x4x8xf32>, vector<2x4x8xf32> -> vector<2x4x8xf32>
    "tpu.trace_stop"() : () -> ()
    %119 = arith.addf %115, %118 : vector<2x4x8xf32>
    %120 = vector.shape_cast %119 : vector<2x4x8xf32> to vector<8x8xf32>
    %121 = tpu.concatenate %79, %120 in 0 : vector<1x8xf32>, vector<8x8xf32> -> vector<9x8xf32>
    %122 = vector.extract_strided_slice %3 {offsets = [0, 16], sizes = [9, 8], strides = [1, 1]} : vector<9x96xf32> to vector<9x8xf32>
    %123 = vector.extract_strided_slice %3 {offsets = [0, 48], sizes = [9, 8], strides = [1, 1]} : vector<9x96xf32> to vector<9x8xf32>
    %124 = vector.extract_strided_slice %3 {offsets = [0, 80], sizes = [9, 8], strides = [1, 1]} : vector<9x96xf32> to vector<9x8xf32>
    %125 = vector.extract_strided_slice %122 {offsets = [0, 0], sizes = [1, 8], strides = [1, 1]} : vector<9x8xf32> to vector<1x8xf32>
    %cst_30 = arith.constant dense<0.000000e+00> : vector<1x9xf32>
    %126 = tpu.matmul %125, %123, %cst_30 {dimension_numbers = #tpu.dot_dimension_numbers<[1], [1], [0], [0], [0, 0, 1, 0], [], []>} : vector<1x8xf32>, vector<9x8xf32>, vector<1x9xf32> -> vector<1x9xf32>
    %cst_31 = arith.constant 0.353553385 : f32
    %127 = vector.broadcast %cst_31 : f32 to vector<1x9xf32>
    %128 = arith.mulf %126, %127 : vector<1x9xf32>
    %cst_32 = arith.constant dense<0xFF800000> : vector<1xf32>
    %129 = vector.multi_reduction <maximumf>, %128, %cst_32 [1] : vector<1x9xf32> to vector<1xf32>
    %130 = vector.shape_cast %129 : vector<1xf32> to vector<1x1xf32>
    %131 = vector.broadcast %130 : vector<1x1xf32> to vector<1x9xf32>
    %132 = arith.subf %128, %131 : vector<1x9xf32>
    %133 = math.exp %132 : vector<1x9xf32>
    %cst_33 = arith.constant dense<0.000000e+00> : vector<1xf32>
    %134 = vector.multi_reduction <add>, %133, %cst_33 [1] : vector<1x9xf32> to vector<1xf32>
    %135 = vector.shape_cast %134 : vector<1xf32> to vector<1x1xf32>
    %136 = vector.broadcast %135 : vector<1x1xf32> to vector<1x9xf32>
    %137 = arith.divf %133, %136 : vector<1x9xf32>
    %cst_34 = arith.constant dense<0.000000e+00> : vector<1x8xf32>
    %138 = tpu.matmul %137, %124, %cst_34 {dimension_numbers = #tpu.dot_dimension_numbers<[1], [0], [0], [1], [0, 0, 1, 1], [], []>} : vector<1x9xf32>, vector<9x8xf32>, vector<1x8xf32> -> vector<1x8xf32>
    %139 = vector.extract_strided_slice %122 {offsets = [1, 0], sizes = [8, 8], strides = [1, 1]} : vector<9x8xf32> to vector<8x8xf32>
    %140 = vector.shape_cast %139 : vector<8x8xf32> to vector<2x4x8xf32>
    %141 = vector.extract_strided_slice %123 {offsets = [1, 0], sizes = [8, 8], strides = [1, 1]} : vector<9x8xf32> to vector<8x8xf32>
    %142 = vector.shape_cast %141 : vector<8x8xf32> to vector<2x4x8xf32>
    %143 = vector.extract_strided_slice %124 {offsets = [1, 0], sizes = [8, 8], strides = [1, 1]} : vector<9x8xf32> to vector<8x8xf32>
    %144 = vector.shape_cast %143 : vector<8x8xf32> to vector<2x4x8xf32>
    "tpu.trace_start"() <{level = 10 : i32, message = "gqd,gkd->gqk"}> : () -> ()
    %cst_35 = arith.constant dense<0.000000e+00> : vector<2x4x4xf32>
    %145 = tpu.matmul %140, %142, %cst_35 {dimension_numbers = #tpu.dot_dimension_numbers<[2], [2], [1], [1], [0, 0, 0, 1, 1, 1], [0], [0]>} : vector<2x4x8xf32>, vector<2x4x8xf32>, vector<2x4x4xf32> -> vector<2x4x4xf32>
    "tpu.trace_stop"() : () -> ()
    %cst_36 = arith.constant 0.353553385 : f32
    %146 = vector.broadcast %cst_36 : f32 to vector<2x4x4xf32>
    %147 = arith.mulf %145, %146 : vector<2x4x4xf32>
    %148 = vector.extract_strided_slice %123 {offsets = [0, 0], sizes = [1, 8], strides = [1, 1]} : vector<9x8xf32> to vector<1x8xf32>
    %149 = vector.shape_cast %148 : vector<1x8xf32> to vector<1x1x8xf32>
    %150 = vector.extract_strided_slice %124 {offsets = [0, 0], sizes = [1, 8], strides = [1, 1]} : vector<9x8xf32> to vector<1x8xf32>
    %151 = vector.shape_cast %150 : vector<1x8xf32> to vector<1x1x8xf32>
    %152 = vector.broadcast %149 : vector<1x1x8xf32> to vector<2x4x8xf32>
    %153 = arith.mulf %140, %152 : vector<2x4x8xf32>
    %cst_37 = arith.constant dense<0.000000e+00> : vector<2x4xf32>
    %154 = vector.multi_reduction <add>, %153, %cst_37 [2] : vector<2x4x8xf32> to vector<2x4xf32>
    %155 = vector.shape_cast %154 : vector<2x4xf32> to vector<2x4x1xf32>
    %cst_38 = arith.constant 0.353553385 : f32
    %156 = vector.broadcast %cst_38 : f32 to vector<2x4x1xf32>
    %157 = arith.mulf %155, %156 : vector<2x4x1xf32>
    %cst_39 = arith.constant dense<0xFF800000> : vector<2x4xf32>
    %158 = vector.multi_reduction <maximumf>, %147, %cst_39 [2] : vector<2x4x4xf32> to vector<2x4xf32>
    %159 = vector.shape_cast %158 : vector<2x4xf32> to vector<2x4x1xf32>
    %160 = arith.maximumf %159, %157 : vector<2x4x1xf32>
    %161 = vector.broadcast %160 : vector<2x4x1xf32> to vector<2x4x4xf32>
    %162 = arith.subf %147, %161 : vector<2x4x4xf32>
    %163 = math.exp %162 : vector<2x4x4xf32>
    %164 = arith.subf %157, %160 : vector<2x4x1xf32>
    %165 = math.exp %164 : vector<2x4x1xf32>
    %cst_40 = arith.constant dense<0.000000e+00> : vector<2x4xf32>
    %166 = vector.multi_reduction <add>, %163, %cst_40 [2] : vector<2x4x4xf32> to vector<2x4xf32>
    %167 = vector.shape_cast %166 : vector<2x4xf32> to vector<2x4x1xf32>
    %168 = arith.addf %165, %167 : vector<2x4x1xf32>
    %cst_41 = arith.constant 1.000000e+00 : f32
    %169 = vector.broadcast %cst_41 : f32 to vector<2x4x1xf32>
    %170 = arith.divf %169, %168 : vector<2x4x1xf32>
    %171 = arith.mulf %165, %170 : vector<2x4x1xf32>
    %172 = vector.broadcast %171 : vector<2x4x1xf32> to vector<2x4x8xf32>
    %173 = vector.broadcast %151 : vector<1x1x8xf32> to vector<2x4x8xf32>
    %174 = arith.mulf %172, %173 : vector<2x4x8xf32>
    %175 = vector.broadcast %170 : vector<2x4x1xf32> to vector<2x4x4xf32>
    %176 = arith.mulf %163, %175 : vector<2x4x4xf32>
    "tpu.trace_start"() <{level = 10 : i32, message = "gqk,gkd->gqd"}> : () -> ()
    %cst_42 = arith.constant dense<0.000000e+00> : vector<2x4x8xf32>
    %177 = tpu.matmul %176, %144, %cst_42 {dimension_numbers = #tpu.dot_dimension_numbers<[2], [1], [1], [2], [0, 0, 0, 1, 1, 2], [0], [0]>} : vector<2x4x4xf32>, vector<2x4x8xf32>, vector<2x4x8xf32> -> vector<2x4x8xf32>
    "tpu.trace_stop"() : () -> ()
    %178 = arith.addf %174, %177 : vector<2x4x8xf32>
    %179 = vector.shape_cast %178 : vector<2x4x8xf32> to vector<8x8xf32>
    %180 = tpu.concatenate %138, %179 in 0 : vector<1x8xf32>, vector<8x8xf32> -> vector<9x8xf32>
    %181 = vector.extract_strided_slice %3 {offsets = [0, 24], sizes = [9, 8], strides = [1, 1]} : vector<9x96xf32> to vector<9x8xf32>
    %182 = vector.extract_strided_slice %3 {offsets = [0, 56], sizes = [9, 8], strides = [1, 1]} : vector<9x96xf32> to vector<9x8xf32>
    %183 = vector.extract_strided_slice %3 {offsets = [0, 88], sizes = [9, 8], strides = [1, 1]} : vector<9x96xf32> to vector<9x8xf32>
    %184 = vector.extract_strided_slice %181 {offsets = [0, 0], sizes = [1, 8], strides = [1, 1]} : vector<9x8xf32> to vector<1x8xf32>
    %cst_43 = arith.constant dense<0.000000e+00> : vector<1x9xf32>
    %185 = tpu.matmul %184, %182, %cst_43 {dimension_numbers = #tpu.dot_dimension_numbers<[1], [1], [0], [0], [0, 0, 1, 0], [], []>} : vector<1x8xf32>, vector<9x8xf32>, vector<1x9xf32> -> vector<1x9xf32>
    %cst_44 = arith.constant 0.353553385 : f32
    %186 = vector.broadcast %cst_44 : f32 to vector<1x9xf32>
    %187 = arith.mulf %185, %186 : vector<1x9xf32>
    %cst_45 = arith.constant dense<0xFF800000> : vector<1xf32>
    %188 = vector.multi_reduction <maximumf>, %187, %cst_45 [1] : vector<1x9xf32> to vector<1xf32>
    %189 = vector.shape_cast %188 : vector<1xf32> to vector<1x1xf32>
    %190 = vector.broadcast %189 : vector<1x1xf32> to vector<1x9xf32>
    %191 = arith.subf %187, %190 : vector<1x9xf32>
    %192 = math.exp %191 : vector<1x9xf32>
    %cst_46 = arith.constant dense<0.000000e+00> : vector<1xf32>
    %193 = vector.multi_reduction <add>, %192, %cst_46 [1] : vector<1x9xf32> to vector<1xf32>
    %194 = vector.shape_cast %193 : vector<1xf32> to vector<1x1xf32>
    %195 = vector.broadcast %194 : vector<1x1xf32> to vector<1x9xf32>
    %196 = arith.divf %192, %195 : vector<1x9xf32>
    %cst_47 = arith.constant dense<0.000000e+00> : vector<1x8xf32>
    %197 = tpu.matmul %196, %183, %cst_47 {dimension_numbers = #tpu.dot_dimension_numbers<[1], [0], [0], [1], [0, 0, 1, 1], [], []>} : vector<1x9xf32>, vector<9x8xf32>, vector<1x8xf32> -> vector<1x8xf32>
    %198 = vector.extract_strided_slice %181 {offsets = [1, 0], sizes = [8, 8], strides = [1, 1]} : vector<9x8xf32> to vector<8x8xf32>
    %199 = vector.shape_cast %198 : vector<8x8xf32> to vector<2x4x8xf32>
    %200 = vector.extract_strided_slice %182 {offsets = [1, 0], sizes = [8, 8], strides = [1, 1]} : vector<9x8xf32> to vector<8x8xf32>
    %201 = vector.shape_cast %200 : vector<8x8xf32> to vector<2x4x8xf32>
    %202 = vector.extract_strided_slice %183 {offsets = [1, 0], sizes = [8, 8], strides = [1, 1]} : vector<9x8xf32> to vector<8x8xf32>
    %203 = vector.shape_cast %202 : vector<8x8xf32> to vector<2x4x8xf32>
    "tpu.trace_start"() <{level = 10 : i32, message = "gqd,gkd->gqk"}> : () -> ()
    %cst_48 = arith.constant dense<0.000000e+00> : vector<2x4x4xf32>
    %204 = tpu.matmul %199, %201, %cst_48 {dimension_numbers = #tpu.dot_dimension_numbers<[2], [2], [1], [1], [0, 0, 0, 1, 1, 1], [0], [0]>} : vector<2x4x8xf32>, vector<2x4x8xf32>, vector<2x4x4xf32> -> vector<2x4x4xf32>
    "tpu.trace_stop"() : () -> ()
    %cst_49 = arith.constant 0.353553385 : f32
    %205 = vector.broadcast %cst_49 : f32 to vector<2x4x4xf32>
    %206 = arith.mulf %204, %205 : vector<2x4x4xf32>
    %207 = vector.extract_strided_slice %182 {offsets = [0, 0], sizes = [1, 8], strides = [1, 1]} : vector<9x8xf32> to vector<1x8xf32>
    %208 = vector.shape_cast %207 : vector<1x8xf32> to vector<1x1x8xf32>
    %209 = vector.extract_strided_slice %183 {offsets = [0, 0], sizes = [1, 8], strides = [1, 1]} : vector<9x8xf32> to vector<1x8xf32>
    %210 = vector.shape_cast %209 : vector<1x8xf32> to vector<1x1x8xf32>
    %211 = vector.broadcast %208 : vector<1x1x8xf32> to vector<2x4x8xf32>
    %212 = arith.mulf %199, %211 : vector<2x4x8xf32>
    %cst_50 = arith.constant dense<0.000000e+00> : vector<2x4xf32>
    %213 = vector.multi_reduction <add>, %212, %cst_50 [2] : vector<2x4x8xf32> to vector<2x4xf32>
    %214 = vector.shape_cast %213 : vector<2x4xf32> to vector<2x4x1xf32>
    %cst_51 = arith.constant 0.353553385 : f32
    %215 = vector.broadcast %cst_51 : f32 to vector<2x4x1xf32>
    %216 = arith.mulf %214, %215 : vector<2x4x1xf32>
    %cst_52 = arith.constant dense<0xFF800000> : vector<2x4xf32>
    %217 = vector.multi_reduction <maximumf>, %206, %cst_52 [2] : vector<2x4x4xf32> to vector<2x4xf32>
    %218 = vector.shape_cast %217 : vector<2x4xf32> to vector<2x4x1xf32>
    %219 = arith.maximumf %218, %216 : vector<2x4x1xf32>
    %220 = vector.broadcast %219 : vector<2x4x1xf32> to vector<2x4x4xf32>
    %221 = arith.subf %206, %220 : vector<2x4x4xf32>
    %222 = math.exp %221 : vector<2x4x4xf32>
    %223 = arith.subf %216, %219 : vector<2x4x1xf32>
    %224 = math.exp %223 : vector<2x4x1xf32>
    %cst_53 = arith.constant dense<0.000000e+00> : vector<2x4xf32>
    %225 = vector.multi_reduction <add>, %222, %cst_53 [2] : vector<2x4x4xf32> to vector<2x4xf32>
    %226 = vector.shape_cast %225 : vector<2x4xf32> to vector<2x4x1xf32>
    %227 = arith.addf %224, %226 : vector<2x4x1xf32>
    %cst_54 = arith.constant 1.000000e+00 : f32
    %228 = vector.broadcast %cst_54 : f32 to vector<2x4x1xf32>
    %229 = arith.divf %228, %227 : vector<2x4x1xf32>
    %230 = arith.mulf %224, %229 : vector<2x4x1xf32>
    %231 = vector.broadcast %230 : vector<2x4x1xf32> to vector<2x4x8xf32>
    %232 = vector.broadcast %210 : vector<1x1x8xf32> to vector<2x4x8xf32>
    %233 = arith.mulf %231, %232 : vector<2x4x8xf32>
    %234 = vector.broadcast %229 : vector<2x4x1xf32> to vector<2x4x4xf32>
    %235 = arith.mulf %222, %234 : vector<2x4x4xf32>
    "tpu.trace_start"() <{level = 10 : i32, message = "gqk,gkd->gqd"}> : () -> ()
    %cst_55 = arith.constant dense<0.000000e+00> : vector<2x4x8xf32>
    %236 = tpu.matmul %235, %203, %cst_55 {dimension_numbers = #tpu.dot_dimension_numbers<[2], [1], [1], [2], [0, 0, 0, 1, 1, 2], [0], [0]>} : vector<2x4x4xf32>, vector<2x4x8xf32>, vector<2x4x8xf32> -> vector<2x4x8xf32>
    "tpu.trace_stop"() : () -> ()
    %237 = arith.addf %233, %236 : vector<2x4x8xf32>
    %238 = vector.shape_cast %237 : vector<2x4x8xf32> to vector<8x8xf32>
    %239 = tpu.concatenate %197, %238 in 0 : vector<1x8xf32>, vector<8x8xf32> -> vector<9x8xf32>
    %240 = tpu.concatenate %62, %121, %180, %239 in 1 : vector<9x8xf32>, vector<9x8xf32>, vector<9x8xf32>, vector<9x8xf32> -> vector<9x32xf32>
    %c0_56 = arith.constant 0 : index
    %c0_57 = arith.constant 0 : index
    %241 = vector.load %arg3[%c0_56, %c0_57] : memref<32x32xf32, #tpu.memory_space<vmem>>, vector<32x32xf32>
    %cst_58 = arith.constant dense<0.000000e+00> : vector<9x32xf32>
    %242 = tpu.matmul %240, %241, %cst_58 {dimension_numbers = #tpu.dot_dimension_numbers<[1], [0], [0], [1], [0, 0, 1, 1], [], []>} : vector<9x32xf32>, vector<32x32xf32>, vector<9x32xf32> -> vector<9x32xf32>
    %c0_59 = arith.constant 0 : index
    %c0_60 = arith.constant 0 : index
    %c0_61 = arith.constant 0 : index
    %243 = vector.load %arg4[%c0_59, %c0_60, %c0_61] : memref<1x9x32xf32, #tpu.memory_space<vmem>>, vector<1x9x32xf32>
    %244 = vector.shape_cast %243 : vector<1x9x32xf32> to vector<9x32xf32>
    %245 = vector.shape_cast %242 : vector<9x32xf32> to vector<1x9x32xf32>
    tpu.vector_store %arg4[%c0_59, %c0_60, %c0_61], %245 {strides = array<i32>} : memref<1x9x32xf32, #tpu.memory_space<vmem>>, vector<1x9x32xf32>,
    return
  }
  func.func @transform_0(%arg0: i32) -> (i32, i32, i32) {
    %c0_i32 = arith.constant 0 : i32
    %c0_i32_0 = arith.constant 0 : i32
    %c0_i32_1 = arith.constant 0 : i32
    return %arg0, %c0_i32, %c0_i32_0 : i32, i32, i32
  }
  func.func @transform_1(%arg0: i32) -> (i32, i32) {
    %c0_i32 = arith.constant 0 : i32
    %c0_i32_0 = arith.constant 0 : i32
    %c0_i32_1 = arith.constant 0 : i32
    return %c0_i32, %c0_i32_0 : i32, i32
  }
  func.func @transform_2(%arg0: i32) -> (i32, i32) {
    %c0_i32 = arith.constant 0 : i32
    %c0_i32_0 = arith.constant 0 : i32
    %c0_i32_1 = arith.constant 0 : i32
    return %c0_i32, %c0_i32_0 : i32, i32
  }
  func.func @transform_3(%arg0: i32) -> (i32, i32, i32) {
    %c0_i32 = arith.constant 0 : i32
    %c0_i32_0 = arith.constant 0 : i32
    %c0_i32_1 = arith.constant 0 : i32
    return %arg0, %c0_i32, %c0_i32_0 : i32, i32, i32
  }
}

</mosaic_0001>

<bundles_post_ra>
// kernel: tpu_custom_call.1
= control target key start
LH: loop header
LB: loop body
LE: loop exit
PB: predicated region body
PF: predicated region fallthrough
CT: control target
= control target key end

     0   :  { %8 = vsyncpa [#allocation3], 0  ;;  %s3275_s12 = smov 0   ;;  %s3711_s0 = inlined_call_operand.vmem [shape: f32[2,9,32], index: 0, kind: input, shape index: {}]   ;;  %s3712_s1 = inlined_call_operand.vmem [shape: f32[32,96], index: 1, kind: input, shape index: {}]   ;;  %s3713_s2 = inlined_call_operand.hbm [shape: f32[32,32], index: 2, kind: input, shape index: {}]   ;;  %s3714_s3 = inlined_call_operand.vmem [shape: f32[2,9,32], index: 3, kind: output, shape index: {}]  }
   0x1 LB: > { %s3281_s13 = sadd.s32 4294967295, %s3232_s12   ;;  %p2707_p0 = scmp.ge.s32.totalorder %s3232_s12, 1  ;;  %s3232_s12 = sphi %s3275_s12, %s14_s12  }
   0x2   : > { %p113_p1 = scmp.lt.s32.totalorder %s3232_s12, 3  ;;  %s3234_s14 = smov [#allocation2]  }
   0x3   : > { %s128_s15 = sshll.u32 %s3234_s14, 4  ;;  %p3715_p3 = scmp.eq.s32.totalorder %s3281_s13, 0  ;;  %s129_s15 = int_to_ptr.vmem [resolvable:$true] %s128_s15 }
   0x4   : > { %p3285_p2 = pnand %p2707_p0, %p113_p1  ;;  %s3194_s20 = scalar_lea.hbm %s3713_s2, 512 }
   0x5   : > { %p3195_p6 = scmp.ne.s32.totalorder %s3713_s2, %s3194_s20  ;;  %p3201_p10 = scmp.lt.u32.totalorder %s3194_s20, %s3713_s2 }
   0x6   : > { %s3717_s16 = scalar_select %p3285_p2, 1, 0 }
   0x7   : > { %p3055_p4 = pneg %p3285_p2 }
   0x9   : > { %p3294_p5 = pnand %p3715_p3, %p3055_p4 }
   0xb   : > { %p3196_p7 = pneg %p3294_p5 }
   0xd   : > { %p3197_p8 = pnand %p3196_p7, %p3195_p6 }
   0xf   : > { %p3198_p9 = pneg %p3197_p8 }
  0x11   : > { %p3203_p11 = pnand %p3201_p10, %p3198_p9 }
  0x13   : > { %3206 = shalt.err (!%p3203_p11)
}
  0x14   : > { %s3207_s25 = scalar_lea.vmem %s129_s15, 512  ;;  %p3215_p1 = scmp.lt.s32.totalorder %s129_s15, %s129_s15 }
  0x15   : > { %p3208_p12 = scmp.ne.s32.totalorder %s129_s15, %s3207_s25  ;;  %p3216_p4 = scmp.lt.s32.totalorder %s3207_s25, %s3207_s25 }
  0x17   : > { %p3210_p13 = pnand %p3208_p12, %p3196_p7  ;;  %p3217_p3 = por %p3216_p4, %p3215_p1 }
  0x19   : > { %p3211_p0 = pneg %p3210_p13 }
  0x1b   : > { %p3218_p2 = pnand %p3217_p3, %p3211_p0 }
  0x1d   : > { %3221 = shalt.err (!%p3218_p2)
}
  0x1e   : > { %s3235_s26 = smov 128   ;;  %s3236_s27 = smov 8  }
  0x1f   : > { %3058 = dma.hbm_to_vmem [thread:$0]  (!%p3294_p5), %s3713_s2, 512, %s129_s15, [#allocation3], %s3235_s26, %s3235_s26, %s3236_s27  }
  0x20   : > { %p3719_p6 = scmp.ne.s32.totalorder %s3717_s16, 0 }
  0x21   : > { %p3720_p8 = scmp.eq.s32.totalorder (!%p3719_p6), %s3281_s13, 0 }
  0x22   : > { %152 = sbr.rel (%p3719_p6) target bundleno = 5457 (0x1551), region = 32 }
  0x29   : > { %3227 = dma.done.wait (%p3720_p8), [#allocation3], 512   ;;  %p3721_p7 = pmov %p3720_p8 }
  0x2a   : > { %p176_p2 = scmp.lt.s32.totalorder %s3281_s13, 1  ;;  %vm192_vm0 = vcmask 261120   ;;  %v188_v0 = vld [vmem:[%s3712_s1] sm:$0xff]  ;;  %v189_v1 = vld [vmem:[%s3712_s1 + $0x8] sm:$0xff]  ;;  %v190_v2 = vld [vmem:[%s3712_s1 + $0x10] sm:$0xff]  ;;  %v3237_v8 = vmov 0.0|0.0   ;;  %v619_v38 = vlaneseq }
  0x2b   : > { %3229 = vsyncadd (%p3721_p7), [#allocation3], 4294966784  ;;  %v3003_v3 = vpack.c.bf16 %v189_v1, %v188_v0  ;;  %v191_v4 = vld [vmem:[%s3712_s1 + $0x18] sm:$0xff]  ;;  %3011 = vmatprep.subr.bf16.mxu1 %v3237_v8  ;;  %vm3238_vm1 = vmmov 0   ;;  %v3239_v9 = vmov 0.0   ;;  %vm453_vm2 = vcmask 1042432  }
  0x2c   : > { %s3729_s13 = smov (!%p176_p2, %s3281_s13), 1  ;;  %v3007_v6 = vpack.c.bf16 %v191_v4, %v190_v2  ;;  %2860 = vmatprep.mubr.msk.f32.mxu1 %vm3238_vm1, %v3239_v9  ;;  %vm454_vm3 = vcmask 1046532   ;;  %s3240_s17 = smov 64   ;;  %vm280_vm5 = vcmask 64512   ;;  %vm379_vm7 = vcmask 1040384  }
  0x2d   : > { %s2775_s30 = sshll.u32 %s3729_s13, 4  ;;  %3004 = vmatprep.subr.bf16.mxu0 %v3003_v3  ;;  %s3241_s18 = smov 96   ;;  %vm3361_vm4 = vmor %vm453_vm2, %vm454_vm3  ;;  %vm3242_vm8 = vmmov 1   ;;  %vm358_vm10 = vcmask 65536   ;;  %v620_v39 = vshrl.u32 %v619_v38, 7  ;;  %vm629_vm11 = vcmask 60416  }
  0x2e   : > { %s180_s6 = scalar_lea.vmem %s3711_s0, %s2775_s30  ;;  %3006 = vmatpush3.bf16.msra.mxu0 %v3003_v3  ;;  %vm3371_vm6 = vmpackc.low %vm280_vm5, %vm280_vm5  ;;  %vm375_vm12 = vcmask 72704   ;;  %s3243_s19 = smov 88   ;;  %vm638_vm13 = vcmask 27648   ;;  %vm683_vm14 = vcmask 1043456   ;;  %vm679_vm15 = vcmask 31744  }
  0x2f   : > { %v186_v5 = vld [vmem:[%s180_s6] sm:$0xff]  ;;  %3008 = vmatprep.subr.bf16.mxu0 %v3007_v6  ;;  %v187_v7 = vld [vmem:[%s180_s6 + $0x8] sm:$0x1]  ;;  %vm3379_vm9 = vmpackc.low %vm379_vm7, %vm3242_vm8  ;;  %v621_v41 = vsub.s32 0, %v620_v39  ;;  %s3244_s20 = smov 120   ;;  %s3245_s21 = smov 56  }
  0x30   : > { %2853 = vmatprep.mubr.msk.f32.mxu0 %vm192_vm0, %v186_v5  ;;  %s3246_s22 = smov 112   ;;  %s3247_s23 = smov 80   ;;  %vm2547_vm2 = vcmask 195584   ;;  %vm2636_vm3 = vcmask 253952  }
  0x31   : > { %s3248_s24 = smov 48   ;;  %s3249_s25 = smov 72  }
  0x32   : > { %3010 = vmatpush3.bf16.msra.mxu0 %v3007_v6  ;;  %s3250_s26 = smov 40   ;;  %s3251_s27 = smov 104  }
  0x33   : > { %2875 = vmatprep.subr.mxu0 %v3239_v9  ;;  %s3252_s28 = smov 8   ;;  %s3253_s29 = smov 16  }
  0x34   : > { %s3254_s4 = smov 24   ;;  %s185_s7 = scalar_lea.vmem %s3714_s3, %s2775_s30 }
  0x35   : > { %2854 = vmatmul.mubr.msk.f32.vlgmr.msra.gmra.mrb[0].mxu0 %vm192_vm0, %v187_v7 }
  0x36   : > { %2877 = vmatprep.mubr.msk.f32.mxu0 %vm3238_vm1, %v3239_v9 }
 0x108   : > { %v2855_v10 = vpop.f32.mrb[0].mxu0 }
 0x109   : > { %v3350_v11 = vpop.f32.mrb[1].mxu0  ;;  %v461_v15 = vrot.slane %v2855_v10, 5 }
 0x10a   : > { %v3353_v12 = vpack.i.bf16 %v2855_v10, %v3350_v11  ;;  %v452_v13 = vcombine.high %v3350_v11, %v3350_v11  ;;  %v2723_v40 = vrot.slane %v3350_v11, 9  ;;  %v3400_v43 = vrot.slane %v3350_v11, %v621_v41 }
 0x10c   : > { %3096 = vrot.lane.b32.xlu1 %v3353_v12, %s3240_s17  ;;  %3091 = vrot.lane.b32.xlu0 %v3353_v12, %s3241_s18  ;;  %v458_v14 = vrot.slane %v452_v13, 5 }
 0x10e   : > { %v460_v16 = vrot.slane %v458_v14, 4  ;;  %v3395_v42 = vsel %vm3361_vm4, %v2723_v40, %v458_v14 }
 0x110   : > { %v3367_v18 = vsel %vm3361_vm4, %v460_v16, %v461_v15 }
 0x17e   : > { %v3092_v19 = vpop.permute.xlu0 %3091  ;;  %v3097_v24 = vpop.permute.xlu1 %3096 }
 0x17f   : > { %v3094_v20 = vunpack.i.h.bf16 %v3092_v19  ;;  %v3093_v21 = vunpack.i.l.bf16 %v3092_v19  ;;  %v3099_v25 = vunpack.i.h.bf16 %v3097_v24  ;;  %v3098_v26 = vunpack.i.l.bf16 %v3097_v24 }
 0x181   : > { %v3012_v23 = vpack.c.bf16 %v3094_v20, %v3093_v21  ;;  %v3016_v28 = vpack.c.bf16 %v3099_v25, %v3098_v26 }
 0x183   : > { %3014 = vmatpush3.bf16.xpose.msk.msra.mxu1 %vm3371_vm6, %v3012_v23 }
 0x184   : > { %3015 = vmatprep.subr.bf16.mxu1 %v3237_v8 }
 0x18a   : > { %2861 = vmatmul.mubr.msk.f32.vlgmr.msra.gmra.mrb[0].mxu1 %vm280_vm5, %v3350_v11 }
 0x18b   : > { %3018 = vmatpush3.bf16.msk.msra.mxu1 %vm3379_vm9, %v3016_v28  ;;  %2867 = vmatprep.mubr.msk.f32.mxu1 %vm3238_vm1, %v3239_v9 }
 0x18c   : > { %2870 = vmatprep.subr.mxu1 %v3239_v9 }
 0x25d   : > { %v353_v29 = vpop.f32.mrb[0].mxu1 }
 0x25e   : > { %v357_v30 = vmul.f32 0.35355338, %v353_v29  ;;  %v2862_v31 = vpop.f32.mrb[1].mxu1 }
 0x260   : > { %v359_v32 = vsel %vm358_vm10, %v357_v30, -inf }
 0x261   : > { %360 = vmax.xlane.f32.xlu0 %v359_v32 }
 0x2ee   : > { %v361_v33 = vpop.xlane.xlu0 %360 }
 0x2ef   : > { %v362_v34 = vsub.f32 %v357_v30, %v361_v33 }
 0x2f1   : > { %v363_v35 = vmul.f32 1.442695, %v362_v34 }
 0x2f3   : > { %3130 = vpow2.f32 %v363_v35 }
 0x2fd   : > { %v3131_v36 = vpop.eup %3130 }
 0x2fe   : > { %v365_v37 = vsel %vm358_vm10, %v3131_v36, 0.0 }
 0x2ff   : > { %366 = vadd.xlane.f32.xlu1 %v365_v37 }
 0x310   : > { %465 = vrot.lane.b32.xlu1 %v3395_v42, %s3241_s18 }
 0x314   : > { %624 = vrot.lane.b32.xlu1 %v3400_v43, %s3241_s18 }
 0x38c   : > { %v367_v44 = vpop.xlane.xlu1 %366 }
 0x38d   : > { %3132 = vrcp.f32 %v367_v44 }
 0x390   : > { %v466_v45 = vpop.permute.xlu1 %465 }
 0x394   : > { %v625_v46 = vpop.permute.xlu1 %624 }
 0x395   : > { %v3405_v47 = vmul.f32 %v625_v46, %v3395_v42  ;;  %v3437_v3 = vmul.f32 %v625_v46, %v3367_v18 }
 0x397   : > { %v3133_v48 = vpop.eup %3132  ;;  %v630_v49 = vsel %vm629_vm11, %v3405_v47, 0.0  ;;  %v633_v4 = vsel %vm629_vm11, %v3437_v3, 0.0 }
 0x398   : > { %v369_v50 = vmul.f32 %v3133_v48, %v3131_v36  ;;  %631 = vadd.xlane.f32.xlu1 %v630_v49 }
 0x39a   : > { %2868 = vmatmul.mubr.msk.f32.vlgmr.msra.gmra.mrb[2].mxu1 %vm375_vm12, %v369_v50 }
 0x39b   : > { %2871 = vmatpush3.xpose.msk.msra.mxu1 %vm280_vm5, %v466_v45  ;;  %2872 = vmatprep.mubr.msk.f32.mxu1 %vm3238_vm1, %v3239_v9 }
 0x39c   : > { %2880 = vmatprep.subr.mxu1 %v3239_v9 }
 0x39e   : > { %2873 = vmatmul.mubr.msk.f32.vlgmr.msra.gmra.mrb[4].mxu1 %vm280_vm5, %v3395_v42 }
 0x39f   : > { %2882 = vmatprep.mubr.msk.f32.mxu1 %vm3238_vm1, %v3239_v9 }
 0x3a9   : > { %3101 = vrot.lane.b32.xlu1 %v3353_v12, %s3243_s19 }
 0x425   : > { %v632_v57 = vpop.xlane.xlu1 %631 }
 0x426   : > { %v636_v58 = vmul.f32 0.35355338, %v632_v57 }
 0x429   : > { %v3102_v14 = vpop.permute.xlu1 %3101 }
 0x42a   : > { %v3104_v15 = vunpack.i.h.bf16 %v3102_v14  ;;  %v3103_v16 = vunpack.i.l.bf16 %v3102_v14 }
 0x42c   : > { %v3020_v21 = vpack.c.bf16 %v3104_v15, %v3103_v16 }
 0x46d   : > { %v3420_v51 = vpop.f32.mrb[2].mxu1 }
 0x46e   : > { %v2869_v52 = vpop.f32.mrb[3].mxu1 }
 0x471   : > { %v537_v53 = vpop.f32.mrb[4].mxu1 }
 0x472   : > { %v617_v54 = vmul.f32 0.35355338, %v537_v53  ;;  %v2874_v55 = vpop.f32.mrb[5].mxu1 }
 0x474   : > { %v639_v56 = vsel %vm638_vm13, %v617_v54, -inf }
 0x475   : > { %640 = vmax.xlane.f32.xlu0 %v639_v56 }
 0x48b   : > { %541 = vrot.lane.b32.xlu0 %v3367_v18, %s3241_s18 }
 0x502   : > { %v641_v59 = vpop.xlane.xlu0 %640 }
 0x503   : > { %v645_v60 = vmax.f32 %v641_v59, %v636_v58 }
 0x505   : > { %v647_v61 = vsub.f32 %v617_v54, %v645_v60  ;;  %v653_v62 = vsub.f32 %v636_v58, %v645_v60 }
 0x506   : > { %v542_v63 = vpop.permute.xlu0 %541 }
 0x507   : > { %v649_v0 = vmul.f32 1.442695, %v647_v61  ;;  %2876 = vmatpush3.xpose.msk.msra.mxu0 %vm280_vm5, %v542_v63  ;;  %v655_v5 = vmul.f32 1.442695, %v653_v62 }
 0x508   : > { %2885 = vmatprep.subr.mxu0 %v3239_v9 }
 0x509   : > { %3134 = vpow2.f32 %v649_v0 }
 0x50a   : > { %2878 = vmatmul.mubr.msk.f32.vlgmr.msra.gmra.mrb[2].mxu0 %vm280_vm5, %v3367_v18  ;;  %3136 = vpow2.f32 %v655_v5 }
 0x50b   : > { %2887 = vmatprep.mubr.msk.f32.mxu0 %vm3238_vm1, %v3239_v9 }
 0x513   : > { %v3135_v1 = vpop.eup %3134 }
 0x514   : > { %v659_v2 = vsel %vm638_vm13, %v3135_v1, 0.0  ;;  %v3137_v6 = vpop.eup %3136 }
 0x515   : > { %660 = vadd.xlane.f32.xlu0 %v659_v2 }
 0x52b   : > { %677 = vrot.lane.b32.xlu0 %v3395_v42, %s3240_s17 }
 0x52f   : > { %851 = vrot.lane.b32.xlu0 %v3350_v11, %s3244_s20 }
 0x54e   : > { %634 = vadd.xlane.f32.xlu0 %v633_v4 }
 0x5a2   : > { %v661_v7 = vpop.xlane.xlu0 %660 }
 0x5a3   : > { %v665_v10 = vadd.f32 %v3137_v6, %v661_v7 }
 0x5a5   : > { %3138 = vrcp.f32 %v665_v10 }
 0x5a6   : > { %v678_v13 = vpop.permute.xlu0 %677 }
 0x5a7   : > { %2881 = vmatpush3.msk.msra.mxu1 %vm683_vm14, %v678_v13 }
 0x5a8   : > { %3019 = vmatprep.subr.bf16.mxu1 %v3237_v8 }
 0x5aa   : > { %v852_v23 = vpop.permute.xlu0 %851 }
 0x5af   : > { %v3139_v17 = vpop.eup %3138 }
 0x5b0   : > { %v675_v19 = vmul.f32 %v3139_v17, %v3135_v1  ;;  %v3443_v20 = vmul.f32 %v3139_v17, %v3137_v6 }
 0x5b2   : > { %2883 = vmatmul.mubr.msk.f32.vlgmr.msra.gmra.mrb[6].mxu1 %vm679_vm15, %v675_v19 }
 0x5b3   : > { %3022 = vmatpush3.bf16.xpose.msk.msra.mxu1 %vm3371_vm6, %v3020_v21  ;;  %2894 = vmatprep.mubr.msk.f32.mxu1 %vm3238_vm1, %v3239_v9 }
 0x5b4   : > { %2909 = vmatprep.subr.mxu1 %v3239_v9 }
 0x5ba   : > { %2895 = vmatmul.mubr.msk.f32.vlgmr.msra.gmra.mrb[8].mxu1 %vm280_vm5, %v852_v23 }
 0x5bb   : > { %2911 = vmatprep.mubr.msk.f32.mxu1 %vm3238_vm1, %v3239_v9 }
 0x5db   : > { %v635_v29 = vpop.xlane.xlu0 %634 }
 0x5dc   : > { %v637_v30 = vmul.f32 0.35355338, %v635_v29 }
 0x5dd   : > { %v613_v24 = vpop.f32.mrb[2].mxu0 }
 0x5de   : > { %v618_v25 = vmul.f32 0.35355338, %v613_v24  ;;  %v2879_v26 = vpop.f32.mrb[3].mxu0 }
 0x5e0   : > { %v642_v28 = vsel %vm638_vm13, %v618_v25, -inf }
 0x5e1   : > { %643 = vmax.xlane.f32.xlu1 %v642_v28 }
 0x5f2   : > { %3106 = vrot.lane.b32.xlu1 %v3353_v12, %s3245_s21 }
 0x5f6   : > { %1027 = vrot.lane.b32.xlu1 %v3395_v42, %s3243_s19 }
 0x5fa   : > { %1185 = vrot.lane.b32.xlu1 %v3405_v47, %s3244_s20 }
 0x66e   : > { %v644_v31 = vpop.xlane.xlu1 %643 }
 0x66f   : > { %v646_v32 = vmax.f32 %v644_v31, %v637_v30 }
 0x671   : > { %v654_v33 = vsub.f32 %v637_v30, %v646_v32  ;;  %v648_v34 = vsub.f32 %v618_v25, %v646_v32 }
 0x672   : > { %v3107_v56 = vpop.permute.xlu1 %3106 }
 0x673   : > { %v651_v35 = vmul.f32 1.442695, %v648_v34  ;;  %v657_v46 = vmul.f32 1.442695, %v654_v33  ;;  %v3109_v58 = vunpack.i.h.bf16 %v3107_v56  ;;  %v3108_v59 = vunpack.i.l.bf16 %v3107_v56 }
 0x675   : > { %3140 = vpow2.f32 %v651_v35  ;;  %v3024_v0 = vpack.c.bf16 %v3109_v58, %v3108_v59 }
 0x676   : > { %3142 = vpow2.f32 %v657_v46  ;;  %v1028_v1 = vpop.permute.xlu1 %1027 }
 0x67a   : > { %v1186_v2 = vpop.permute.xlu1 %1185 }
 0x67b   : > { %v1191_v4 = vsel %vm629_vm11, %v1186_v2, 0.0 }
 0x67f   : > { %v3141_v44 = vpop.eup %3140 }
 0x680   : > { %v662_v45 = vsel %vm638_vm13, %v3141_v44, 0.0  ;;  %v3143_v52 = vpop.eup %3142 }
 0x685   : > { %v3461_v36 = vpop.f32.mrb[6].mxu1 }
 0x686   : > { %v2884_v37 = vpop.f32.mrb[7].mxu1 }
 0x68d   : > { %v929_v38 = vpop.f32.mrb[8].mxu1 }
 0x68e   : > { %v933_v39 = vmul.f32 0.35355338, %v929_v38  ;;  %v2896_v40 = vpop.f32.mrb[9].mxu1 }
 0x690   : > { %v934_v41 = vsel %vm358_vm10, %v933_v39, -inf }
 0x691   : > { %935 = vmax.xlane.f32.xlu0 %v934_v41 }
 0x695   : > { %663 = vadd.xlane.f32.xlu0 %v662_v45 }
 0x6ab   : > { %756 = vrot.lane.b32.xlu0 %v3367_v18, %s3240_s17 }
 0x71e   : > { %v936_v48 = vpop.xlane.xlu0 %935 }
 0x71f   : > { %v937_v49 = vsub.f32 %v933_v39, %v936_v48 }
 0x721   : > { %v938_v50 = vmul.f32 1.442695, %v937_v49 }
 0x722   : > { %v664_v53 = vpop.xlane.xlu0 %663 }
 0x723   : > { %3144 = vpow2.f32 %v938_v50  ;;  %v666_v54 = vadd.f32 %v3143_v52, %v664_v53 }
 0x725   : > { %3146 = vrcp.f32 %v666_v54 }
 0x726   : > { %v757_v55 = vpop.permute.xlu0 %756 }
 0x727   : > { %2886 = vmatpush3.msk.msra.mxu0 %vm683_vm14, %v757_v55 }
 0x728   : > { %3023 = vmatprep.subr.bf16.mxu0 %v3237_v8 }
 0x72d   : > { %v3145_v57 = vpop.eup %3144 }
 0x72e   : > { %v940_v60 = vsel %vm358_vm10, %v3145_v57, 0.0 }
 0x72f   : > { %v3147_v61 = vpop.eup %3146  ;;  %941 = vadd.xlane.f32.xlu0 %v940_v60 }
 0x730   : > { %v676_v62 = vmul.f32 %v3147_v61, %v3141_v44  ;;  %v3470_v63 = vmul.f32 %v3147_v61, %v3143_v52 }
 0x732   : > { %2888 = vmatmul.mubr.msk.f32.vlgmr.msra.gmra.mrb[4].mxu0 %vm679_vm15, %v676_v62 }
 0x733   : > { %3026 = vmatpush3.bf16.msk.msra.mxu0 %vm3379_vm9, %v3024_v0  ;;  %2901 = vmatprep.mubr.msk.f32.mxu0 %vm3238_vm1, %v3239_v9 }
 0x734   : > { %2904 = vmatprep.subr.mxu0 %v3239_v9 }
 0x745   : > { %1025 = vrot.lane.b32.xlu0 %v3395_v42, %s3244_s20 }
 0x764   : > { %1192 = vadd.xlane.f32.xlu0 %v1191_v4 }
 0x77a   : > { %1105 = vrot.lane.b32.xlu0 %v3367_v18, %s3243_s19 }
 0x7bc   : > { %v942_v5 = vpop.xlane.xlu0 %941 }
 0x7bd   : > { %3148 = vrcp.f32 %v942_v5 }
 0x7c0   : > { %v1026_v10 = vpop.permute.xlu0 %1025 }
 0x7c7   : > { %v3149_v6 = vpop.eup %3148 }
 0x7c8   : > { %v944_v7 = vmul.f32 %v3149_v6, %v3145_v57 }
 0x7ca   : > { %2902 = vmatmul.mubr.msk.f32.vlgmr.msra.gmra.mrb[6].mxu0 %vm375_vm12, %v944_v7 }
 0x7cb   : > { %2905 = vmatpush3.xpose.msk.msra.mxu0 %vm280_vm5, %v1028_v1  ;;  %2906 = vmatprep.mubr.msk.f32.mxu0 %vm3238_vm1, %v3239_v9 }
 0x7cc   : > { %2914 = vmatprep.subr.mxu0 %v3239_v9 }
 0x7ce   : > { %2907 = vmatmul.mubr.msk.f32.vlgmr.msra.gmra.mrb[8].mxu0 %vm280_vm5, %v1026_v10 }
 0x7cf   : > { %2916 = vmatprep.mubr.msk.f32.mxu0 %vm3238_vm1, %v3239_v9 }
 0x7f1   : > { %v1193_v13 = vpop.xlane.xlu0 %1192 }
 0x7f2   : > { %v1197_v26 = vmul.f32 0.35355338, %v1193_v13 }
 0x7f5   : > { %v1106_v14 = vpop.permute.xlu0 %1105 }
 0x7f6   : > { %2910 = vmatpush3.xpose.msk.msra.mxu1 %vm280_vm5, %v1106_v14 }
 0x7f7   : > { %2919 = vmatprep.subr.mxu1 %v3239_v9 }
 0x805   : > { %v3493_v15 = vpop.f32.mrb[4].mxu0 }
 0x806   : > { %v2889_v16 = vpop.f32.mrb[5].mxu0 }
 0x89d   : > { %v3495_v17 = vpop.f32.mrb[6].mxu0 }
 0x89e   : > { %v2903_v19 = vpop.f32.mrb[7].mxu0 }
 0x8a1   : > { %v1099_v21 = vpop.f32.mrb[8].mxu0 }
 0x8a2   : > { %v1181_v23 = vmul.f32 0.35355338, %v1099_v21  ;;  %v2908_v24 = vpop.f32.mrb[9].mxu0 }
 0x8a4   : > { %v1199_v25 = vsel %vm638_vm13, %v1181_v23, -inf }
 0x8a5   : > { %1200 = vmax.xlane.f32.xlu1 %v1199_v25 }
 0x8b6   : > { %1237 = vrot.lane.b32.xlu1 %v3395_v42, %s3245_s21 }
 0x8ba   : > { %1103 = vrot.lane.b32.xlu1 %v3367_v18, %s3244_s20 }
 0x8be   : > { %1409 = vrot.lane.b32.xlu1 %v3350_v11, %s3246_s22 }
 0x932   : > { %v1201_v28 = vpop.xlane.xlu1 %1200 }
 0x933   : > { %v1205_v29 = vmax.f32 %v1201_v28, %v1197_v26 }
 0x935   : > { %v1207_v30 = vsub.f32 %v1181_v23, %v1205_v29  ;;  %v1213_v31 = vsub.f32 %v1197_v26, %v1205_v29 }
 0x936   : > { %v1238_v32 = vpop.permute.xlu1 %1237 }
 0x937   : > { %v1209_v33 = vmul.f32 1.442695, %v1207_v30  ;;  %2915 = vmatpush3.msk.msra.mxu0 %vm683_vm14, %v1238_v32  ;;  %v1215_v38 = vmul.f32 1.442695, %v1213_v31 }
 0x938   : > { %3027 = vmatprep.subr.bf16.mxu0 %v3237_v8 }
 0x939   : > { %3150 = vpow2.f32 %v1209_v33 }
 0x93a   : > { %v1104_v34 = vpop.permute.xlu1 %1103  ;;  %3152 = vpow2.f32 %v1215_v38 }
 0x93b   : > { %2912 = vmatmul.mubr.msk.f32.vlgmr.msra.gmra.mrb[10].mxu1 %vm280_vm5, %v1104_v34 }
 0x93c   : > { %2921 = vmatprep.mubr.msk.f32.mxu1 %vm3238_vm1, %v3239_v9 }
 0x93e   : > { %v1410_v55 = vpop.permute.xlu1 %1409 }
 0x943   : > { %v3151_v35 = vpop.eup %3150 }
 0x944   : > { %v1219_v37 = vsel %vm638_vm13, %v3151_v35, 0.0  ;;  %v3153_v39 = vpop.eup %3152 }
 0x945   : > { %1220 = vadd.xlane.f32.xlu0 %v1219_v37 }
 0x95b   : > { %3111 = vrot.lane.b32.xlu0 %v3353_v12, %s3247_s23 }
 0x95f   : > { %1187 = vrot.lane.b32.xlu0 %v3437_v3, %s3244_s20 }
 0x9d2   : > { %v1221_v40 = vpop.xlane.xlu0 %1220 }
 0x9d3   : > { %v1225_v41 = vadd.f32 %v3153_v39, %v1221_v40 }
 0x9d5   : > { %3154 = vrcp.f32 %v1225_v41 }
 0x9d6   : > { %v3112_v44 = vpop.permute.xlu0 %3111 }
 0x9d7   : > { %v3114_v48 = vunpack.i.h.bf16 %v3112_v44  ;;  %v3113_v49 = vunpack.i.l.bf16 %v3112_v44 }
 0x9d9   : > { %v3028_v54 = vpack.c.bf16 %v3114_v48, %v3113_v49 }
 0x9da   : > { %v1188_v45 = vpop.permute.xlu0 %1187 }
 0x9db   : > { %v1194_v46 = vsel %vm629_vm11, %v1188_v45, 0.0 }
 0x9dc   : > { %1195 = vadd.xlane.f32.xlu1 %v1194_v46 }
 0x9df   : > { %v3155_v50 = vpop.eup %3154 }
 0x9e0   : > { %v1235_v52 = vmul.f32 %v3155_v50, %v3151_v35  ;;  %v3515_v53 = vmul.f32 %v3155_v50, %v3153_v39 }
 0x9e2   : > { %2917 = vmatmul.mubr.msk.f32.vlgmr.msra.gmra.mrb[10].mxu0 %vm679_vm15, %v1235_v52 }
 0x9e3   : > { %3030 = vmatpush3.bf16.xpose.msk.msra.mxu0 %vm3371_vm6, %v3028_v54  ;;  %2928 = vmatprep.mubr.msk.f32.mxu0 %vm3238_vm1, %v3239_v9 }
 0x9e4   : > { %2943 = vmatprep.subr.mxu0 %v3239_v9 }
 0x9ea   : > { %2929 = vmatmul.mubr.msk.f32.vlgmr.msra.gmra.mrb[12].mxu0 %vm280_vm5, %v1410_v55 }
 0x9eb   : > { %2945 = vmatprep.mubr.msk.f32.mxu0 %vm3238_vm1, %v3239_v9 }
 0xa0e   : > { %v1177_v56 = vpop.f32.mrb[10].mxu1 }
 0xa0f   : > { %v1182_v57 = vmul.f32 0.35355338, %v1177_v56  ;;  %v2913_v58 = vpop.f32.mrb[11].mxu1 }
 0xa11   : > { %v1202_v59 = vsel %vm638_vm13, %v1182_v57, -inf }
 0xa12   : > { %1203 = vmax.xlane.f32.xlu0 %v1202_v59 }
 0xa69   : > { %v1196_v60 = vpop.xlane.xlu1 %1195 }
 0xa6a   : > { %v1198_v61 = vmul.f32 0.35355338, %v1196_v60 }
 0xa9f   : > { %v1204_v62 = vpop.xlane.xlu0 %1203 }
 0xaa0   : > { %v1206_v0 = vmax.f32 %v1204_v62, %v1198_v61 }
 0xaa2   : > { %v1208_v1 = vsub.f32 %v1182_v57, %v1206_v0  ;;  %v1214_v2 = vsub.f32 %v1198_v61, %v1206_v0 }
 0xaa4   : > { %v1211_v4 = vmul.f32 1.442695, %v1208_v1  ;;  %v1217_v21 = vmul.f32 1.442695, %v1214_v2 }
 0xaa6   : > { %3156 = vpow2.f32 %v1211_v4 }
 0xaa7   : > { %3158 = vpow2.f32 %v1217_v21 }
 0xab0   : > { %v3157_v5 = vpop.eup %3156 }
 0xab1   : > { %v1222_v6 = vsel %vm638_vm13, %v3157_v5, 0.0  ;;  %v3159_v23 = vpop.eup %3158 }
 0xab2   : > { %1223 = vadd.xlane.f32.xlu1 %v1222_v6 }
 0xab5   : > { %v3528_v7 = vpop.f32.mrb[10].mxu0 }
 0xab6   : > { %v2918_v10 = vpop.f32.mrb[11].mxu0 }
 0xabd   : > { %v1487_v13 = vpop.f32.mrb[12].mxu0 }
 0xabe   : > { %v1491_v14 = vmul.f32 0.35355338, %v1487_v13  ;;  %v2930_v16 = vpop.f32.mrb[13].mxu0 }
 0xac0   : > { %v1492_v19 = vsel %vm358_vm10, %v1491_v14, -inf }
 0xac1   : > { %1493 = vmax.xlane.f32.xlu0 %v1492_v19 }
 0xac3   : > { %1314 = vrot.lane.b32.xlu1 %v3367_v18, %s3245_s21 }
 0xac7   : > { %1585 = vrot.lane.b32.xlu1 %v3395_v42, %s3247_s23 }
 0xacb   : > { %1583 = vrot.lane.b32.xlu1 %v3395_v42, %s3246_s22 }
 0xb3f   : > { %v1224_v24 = vpop.xlane.xlu1 %1223 }
 0xb40   : > { %v1226_v25 = vadd.f32 %v3159_v23, %v1224_v24 }
 0xb42   : > { %3160 = vrcp.f32 %v1226_v25 }
 0xb43   : > { %v1315_v26 = vpop.permute.xlu1 %1314 }
 0xb44   : > { %2920 = vmatpush3.msk.msra.mxu1 %vm683_vm14, %v1315_v26 }
 0xb45   : > { %3031 = vmatprep.subr.bf16.mxu1 %v3237_v8 }
 0xb47   : > { %v1586_v49 = vpop.permute.xlu1 %1585 }
 0xb4b   : > { %v1584_v50 = vpop.permute.xlu1 %1583 }
 0xb4c   : > { %v3161_v28 = vpop.eup %3160 }
 0xb4d   : > { %v1236_v29 = vmul.f32 %v3161_v28, %v3157_v5  ;;  %v3539_v30 = vmul.f32 %v3161_v28, %v3159_v23 }
 0xb4e   : > { %v1494_v31 = vpop.xlane.xlu0 %1493 }
 0xb4f   : > { %v1495_v32 = vsub.f32 %v1491_v14, %v1494_v31  ;;  %2922 = vmatmul.mubr.msk.f32.vlgmr.msra.gmra.mrb[12].mxu1 %vm679_vm15, %v1236_v29 }
 0xb50   : > { %2935 = vmatprep.mubr.msk.f32.mxu1 %vm3238_vm1, %v3239_v9 }
 0xb51   : > { %v1496_v33 = vmul.f32 1.442695, %v1495_v32 }
 0xb53   : > { %3162 = vpow2.f32 %v1496_v33 }
 0xb5d   : > { %v3163_v34 = vpop.eup %3162 }
 0xb5e   : > { %v1498_v35 = vsel %vm358_vm10, %v3163_v34, 0.0 }
 0xb5f   : > { %1499 = vadd.xlane.f32.xlu0 %v1498_v35 }
 0xb75   : > { %3116 = vrot.lane.b32.xlu0 %v3353_v12, %s3248_s24 }
 0xb79   : > { %1741 = vrot.lane.b32.xlu0 %v3405_v47, %s3246_s22 }
 0xbec   : > { %v1500_v37 = vpop.xlane.xlu0 %1499 }
 0xbed   : > { %3164 = vrcp.f32 %v1500_v37 }
 0xbf0   : > { %v3117_v38 = vpop.permute.xlu0 %3116 }
 0xbf1   : > { %v3119_v39 = vunpack.i.h.bf16 %v3117_v38  ;;  %v3118_v40 = vunpack.i.l.bf16 %v3117_v38 }
 0xbf3   : > { %v3032_v41 = vpack.c.bf16 %v3119_v39, %v3118_v40 }
 0xbf4   : > { %v1742_v44 = vpop.permute.xlu0 %1741 }
 0xbf5   : > { %3034 = vmatpush3.bf16.msk.msra.mxu1 %vm3379_vm9, %v3032_v41  ;;  %v1747_v45 = vsel %vm629_vm11, %v1742_v44, 0.0 }
 0xbf6   : > { %1748 = vadd.xlane.f32.xlu1 %v1747_v45  ;;  %2938 = vmatprep.subr.mxu1 %v3239_v9 }
 0xbf7   : > { %v3165_v46 = vpop.eup %3164 }
 0xbf8   : > { %v1502_v48 = vmul.f32 %v3165_v46, %v3163_v34 }
 0xbfa   : > { %2936 = vmatmul.mubr.msk.f32.vlgmr.msra.gmra.mrb[14].mxu1 %vm375_vm12, %v1502_v48 }
 0xbfb   : > { %2940 = vmatprep.mubr.msk.f32.mxu1 %vm3238_vm1, %v3239_v9 }
 0xbfe   : > { %2939 = vmatpush3.xpose.msk.msra.mxu1 %vm280_vm5, %v1586_v49 }
 0xbff   : > { %2948 = vmatprep.subr.mxu1 %v3239_v9 }
 0xc01   : > { %2941 = vmatmul.mubr.msk.f32.vlgmr.msra.gmra.mrb[16].mxu1 %vm280_vm5, %v1584_v50 }
 0xc02   : > { %2950 = vmatprep.mubr.msk.f32.mxu1 %vm3238_vm1, %v3239_v9 }
 0xc07   : > { %1663 = vrot.lane.b32.xlu1 %v3367_v18, %s3247_s23 }
 0xc0b   : > { %1661 = vrot.lane.b32.xlu1 %v3367_v18, %s3246_s22 }
 0xc0f   : > { %3121 = vrot.lane.b32.xlu1 %v3353_v12, %s3249_s25 }
 0xc13   : > { %1743 = vrot.lane.b32.xlu1 %v3437_v3, %s3246_s22 }
 0xc22   : > { %v3569_v52 = vpop.f32.mrb[12].mxu1 }
 0xc23   : > { %v2923_v54 = vpop.f32.mrb[13].mxu1 }
 0xc83   : > { %v1749_v55 = vpop.xlane.xlu1 %1748 }
 0xc84   : > { %v1753_v6 = vmul.f32 0.35355338, %v1749_v55 }
 0xc87   : > { %v1664_v56 = vpop.permute.xlu1 %1663 }
 0xc88   : > { %2944 = vmatpush3.xpose.msk.msra.mxu0 %vm280_vm5, %v1664_v56 }
 0xc89   : > { %2953 = vmatprep.subr.mxu0 %v3239_v9 }
 0xc8b   : > { %v1662_v57 = vpop.permute.xlu1 %1661 }
 0xc8c   : > { %2946 = vmatmul.mubr.msk.f32.vlgmr.msra.gmra.mrb[14].mxu0 %vm280_vm5, %v1662_v57 }
 0xc8d   : > { %2955 = vmatprep.mubr.msk.f32.mxu0 %vm3238_vm1, %v3239_v9 }
 0xc8f   : > { %v3122_v24 = vpop.permute.xlu1 %3121 }
 0xc90   : > { %v3124_v33 = vunpack.i.h.bf16 %v3122_v24  ;;  %v3123_v34 = vunpack.i.l.bf16 %v3122_v24 }
 0xc92   : > { %v3036_v38 = vpack.c.bf16 %v3124_v33, %v3123_v34 }
 0xc93   : > { %v1744_v25 = vpop.permute.xlu1 %1743 }
 0xc94   : > { %v1750_v26 = vsel %vm629_vm11, %v1744_v25, 0.0 }
 0xccd   : > { %v3576_v58 = vpop.f32.mrb[14].mxu1 }
 0xcce   : > { %v2937_v59 = vpop.f32.mrb[15].mxu1 }
 0xcd4   : > { %v1657_v60 = vpop.f32.mrb[16].mxu1 }
 0xcd5   : > { %v1739_v61 = vmul.f32 0.35355338, %v1657_v60  ;;  %v2942_v62 = vpop.f32.mrb[17].mxu1 }
 0xcd7   : > { %v1755_v0 = vsel %vm638_vm13, %v1739_v61, -inf }
 0xcd8   : > { %1756 = vmax.xlane.f32.xlu0 %v1755_v0 }
 0xd5f   : > { %v1735_v1 = vpop.f32.mrb[14].mxu0 }
 0xd60   : > { %v1740_v2 = vmul.f32 0.35355338, %v1735_v1  ;;  %v2947_v4 = vpop.f32.mrb[15].mxu0 }
 0xd62   : > { %v1758_v5 = vsel %vm638_vm13, %v1740_v2, -inf }
 0xd63   : > { %1759 = vmax.xlane.f32.xlu1 %v1758_v5 }
 0xd65   : > { %v1757_v10 = vpop.xlane.xlu0 %1756 }
 0xd66   : > { %v1761_v13 = vmax.f32 %v1757_v10, %v1753_v6 }
 0xd68   : > { %v1763_v14 = vsub.f32 %v1739_v61, %v1761_v13  ;;  %v1769_v16 = vsub.f32 %v1753_v6, %v1761_v13 }
 0xd6a   : > { %v1765_v19 = vmul.f32 1.442695, %v1763_v14 }
 0xd6c   : > { %3166 = vpow2.f32 %v1765_v19 }
 0xd74   : > { %3126 = vrot.lane.b32.xlu1 %v3353_v12, %s3250_s26  ;;  %v1771_v12 = vmul.f32 1.442695, %v1769_v16 }
 0xd76   : > { %v3167_v21 = vpop.eup %3166  ;;  %3168 = vpow2.f32 %v1771_v12 }
 0xd77   : > { %v1775_v23 = vsel %vm638_vm13, %v3167_v21, 0.0 }
 0xd78   : > { %2141 = vrot.lane.b32.xlu1 %v3395_v42, %s3249_s25  ;;  %1776 = vadd.xlane.f32.xlu0 %v1775_v23 }
 0xd80   : > { %v3169_v28 = vpop.eup %3168 }
 0xd8e   : > { %1793 = vrot.lane.b32.xlu0 %v3395_v42, %s3248_s24 }
 0xd92   : > { %1965 = vrot.lane.b32.xlu0 %v3350_v11, %s3251_s27 }
 0xdb1   : > { %1751 = vadd.xlane.f32.xlu0 %v1750_v26 }
 0xdf0   : > { %v1760_v44 = vpop.xlane.xlu1 %1759 }
 0xdf4   : > { %v3127_v10 = vpop.permute.xlu1 %3126 }
 0xdf5   : > { %v3129_v14 = vunpack.i.h.bf16 %v3127_v10  ;;  %v3128_v16 = vunpack.i.l.bf16 %v3127_v10 }
 0xdf7   : > { %v3040_v25 = vpack.c.bf16 %v3129_v14, %v3128_v16 }
 0xe05   : > { %v1777_v29 = vpop.xlane.xlu0 %1776 }
 0xe06   : > { %v1781_v31 = vadd.f32 %v3169_v28, %v1777_v29 }
 0xe08   : > { %3170 = vrcp.f32 %v1781_v31 }
 0xe09   : > { %v1794_v32 = vpop.permute.xlu0 %1793 }
 0xe0a   : > { %2949 = vmatpush3.msk.msra.mxu1 %vm683_vm14, %v1794_v32 }
 0xe0b   : > { %3035 = vmatprep.subr.bf16.mxu1 %v3237_v8 }
 0xe0d   : > { %v1966_v39 = vpop.permute.xlu0 %1965 }
 0xe12   : > { %v3171_v35 = vpop.eup %3170 }
 0xe13   : > { %v1791_v11 = vmul.f32 %v3171_v35, %v3167_v21  ;;  %v3592_v37 = vmul.f32 %v3171_v35, %v3169_v28  ;;  %v2142_v28 = vpop.permute.xlu1 %2141 }
 0xe15   : > { %2951 = vmatmul.mubr.msk.f32.vlgmr.msra.gmra.mrb[18].mxu1 %vm679_vm15, %v1791_v11 }
 0xe16   : > { %3038 = vmatpush3.bf16.xpose.msk.msra.mxu1 %vm3371_vm6, %v3036_v38  ;;  %2962 = vmatprep.mubr.msk.f32.mxu1 %vm3238_vm1, %v3239_v9 }
 0xe17   : > { %2977 = vmatprep.subr.mxu1 %v3239_v9 }
 0xe1d   : > { %2963 = vmatmul.mubr.msk.f32.vlgmr.msra.gmra.mrb[20].mxu1 %vm280_vm5, %v1966_v39 }
 0xe1e   : > { %2979 = vmatprep.mubr.msk.f32.mxu1 %vm3238_vm1, %v3239_v9 }
 0xe3e   : > { %v1752_v40 = vpop.xlane.xlu0 %1751 }
 0xe3f   : > { %v1754_v41 = vmul.f32 0.35355338, %v1752_v40 }
 0xe41   : > { %v1762_v45 = vmax.f32 %v1760_v44, %v1754_v41 }
 0xe43   : > { %v1770_v46 = vsub.f32 %v1754_v41, %v1762_v45  ;;  %v1764_v48 = vsub.f32 %v1740_v2, %v1762_v45 }
 0xe45   : > { %v1767_v49 = vmul.f32 1.442695, %v1764_v48  ;;  %v1773_v61 = vmul.f32 1.442695, %v1770_v46 }
 0xe47   : > { %3172 = vpow2.f32 %v1767_v49 }
 0xe48   : > { %3174 = vpow2.f32 %v1773_v61 }
 0xe51   : > { %v3173_v59 = vpop.eup %3172 }
 0xe52   : > { %v1778_v60 = vsel %vm638_vm13, %v3173_v59, 0.0  ;;  %v3175_v2 = vpop.eup %3174 }
 0xee8   : > { %v3603_v22 = vpop.f32.mrb[18].mxu1 }
 0xee9   : > { %v2952_v50 = vpop.f32.mrb[19].mxu1 }
 0xef0   : > { %v2043_v54 = vpop.f32.mrb[20].mxu1 }
 0xef1   : > { %v2047_v55 = vmul.f32 0.35355338, %v2043_v54  ;;  %v2964_v56 = vpop.f32.mrb[21].mxu1 }
 0xef3   : > { %v2048_v57 = vsel %vm358_vm10, %v2047_v55, -inf }
 0xef4   : > { %2049 = vmax.xlane.f32.xlu0 %v2048_v57 }
 0xef8   : > { %1779 = vadd.xlane.f32.xlu0 %v1778_v60 }
 0xf0e   : > { %1870 = vrot.lane.b32.xlu0 %v3367_v18, %s3248_s24 }
 0xf12   : > { %2219 = vrot.lane.b32.xlu0 %v3367_v18, %s3249_s25 }
 0xf16   : > { %2217 = vrot.lane.b32.xlu0 %v3367_v18, %s3251_s27 }
 0xf1a   : > { %2299 = vrot.lane.b32.xlu0 %v3437_v3, %s3251_s27 }
 0xf81   : > { %v2050_v62 = vpop.xlane.xlu0 %2049 }
 0xf82   : > { %v2051_v0 = vsub.f32 %v2047_v55, %v2050_v62 }
 0xf84   : > { %v2052_v1 = vmul.f32 1.442695, %v2051_v0 }
 0xf85   : > { %v1780_v4 = vpop.xlane.xlu0 %1779 }
 0xf86   : > { %3176 = vpow2.f32 %v2052_v1  ;;  %v1782_v5 = vadd.f32 %v3175_v2, %v1780_v4 }
 0xf88   : > { %3178 = vrcp.f32 %v1782_v5 }
 0xf89   : > { %v1871_v6 = vpop.permute.xlu0 %1870 }
 0xf8a   : > { %2954 = vmatpush3.msk.msra.mxu0 %vm683_vm14, %v1871_v6 }
 0xf8b   : > { %3039 = vmatprep.subr.bf16.mxu0 %v3237_v8 }
 0xf8d   : > { %v2220_v13 = vpop.permute.xlu0 %2219 }
 0xf8e   : > { %2978 = vmatpush3.xpose.msk.msra.mxu1 %vm280_vm5, %v2220_v13 }
 0xf8f   : > { %2987 = vmatprep.subr.mxu1 %v3239_v9 }
 0xf90   : > { %v3177_v3 = vpop.eup %3176 }
 0xf91   : > { %v2218_v19 = vpop.permute.xlu0 %2217  ;;  %v2054_v21 = vsel %vm358_vm10, %v3177_v3, 0.0 }
 0xf92   : > { %v3179_v23 = vpop.eup %3178  ;;  %2055 = vadd.xlane.f32.xlu1 %v2054_v21  ;;  %2980 = vmatmul.mubr.msk.f32.vlgmr.msra.gmra.mrb[22].mxu1 %vm280_vm5, %v2218_v19 }
 0xf93   : > { %v1792_v24 = vmul.f32 %v3179_v23, %v3173_v59  ;;  %2989 = vmatprep.mubr.msk.f32.mxu1 %vm3238_vm1, %v3239_v9  ;;  %v3623_v8 = vmul.f32 %v3179_v23, %v3175_v2 }
 0xf95   : > { %2956 = vmatmul.mubr.msk.f32.vlgmr.msra.gmra.mrb[16].mxu0 %vm679_vm15, %v1792_v24  ;;  %v2300_v26 = vpop.permute.xlu0 %2299 }
 0xf96   : > { %3042 = vmatpush3.bf16.msk.msra.mxu0 %vm3379_vm9, %v3040_v25  ;;  %v2306_v12 = vsel %vm629_vm11, %v2300_v26, 0.0  ;;  %2969 = vmatprep.mubr.msk.f32.mxu0 %vm3238_vm1, %v3239_v9 }
 0xf97   : > { %2307 = vadd.xlane.f32.xlu0 %v2306_v12  ;;  %2972 = vmatprep.subr.mxu0 %v3239_v9 }
 0xfa3   : > { %2139 = vrot.lane.b32.xlu1 %v3395_v42, %s3251_s27 }
 0xfa7   : > { %2297 = vrot.lane.b32.xlu1 %v3405_v47, %s3251_s27 }
0x101f   : > { %v2056_v29 = vpop.xlane.xlu1 %2055 }
0x1020   : > { %3180 = vrcp.f32 %v2056_v29 }
0x1023   : > { %v2140_v31 = vpop.permute.xlu1 %2139 }
0x1024   : > { %v2308_v41 = vpop.xlane.xlu0 %2307 }
0x1025   : > { %v2310_v45 = vmul.f32 0.35355338, %v2308_v41 }
0x1027   : > { %v2298_v27 = vpop.permute.xlu1 %2297 }
0x1028   : > { %v2303_v32 = vsel %vm629_vm11, %v2298_v27, 0.0 }
0x1029   : > { %2304 = vadd.xlane.f32.xlu1 %v2303_v32 }
0x102a   : > { %v3181_v33 = vpop.eup %3180 }
0x102b   : > { %v2058_v34 = vmul.f32 %v3181_v33, %v3177_v3 }
0x102d   : > { %2970 = vmatmul.mubr.msk.f32.vlgmr.msra.gmra.mrb[18].mxu0 %vm375_vm12, %v2058_v34  ;;  %v1790_v34 = vmul.f32 %v3623_v8, %v3400_v43 }
0x102e   : > { %2973 = vmatpush3.xpose.msk.msra.mxu0 %vm280_vm5, %v2142_v28  ;;  %2974 = vmatprep.mubr.msk.f32.mxu0 %vm3238_vm1, %v3239_v9 }
0x102f   : > { %2982 = vmatprep.subr.mxu0 %v3239_v9 }
0x1031   : > { %2975 = vmatmul.mubr.msk.f32.vlgmr.msra.gmra.mrb[20].mxu0 %vm280_vm5, %v2140_v31  ;;  %v1234_v31 = vmul.f32 %v3539_v30, %v3400_v43 }
0x1032   : > { %2984 = vmatprep.mubr.msk.f32.mxu0 %vm3238_vm1, %v3239_v9  ;;  %vm2544_vm1 = vcmask 130048  }
0x1065   : > { %v2291_v47 = vpop.f32.mrb[22].mxu1 }
0x1066   : > { %v2296_v35 = vmul.f32 0.35355338, %v2291_v47  ;;  %v2981_v11 = vpop.f32.mrb[23].mxu1 }
0x1068   : > { %v1943_v38 = vpop.f32.mrb[16].mxu0  ;;  %v2314_v39 = vsel %vm638_vm13, %v2296_v35, -inf }
0x1069   : > { %v2957_v40 = vpop.f32.mrb[17].mxu0  ;;  %2315 = vmax.xlane.f32.xlu1 %v2314_v39 }
0x10b6   : > { %v2305_v44 = vpop.xlane.xlu1 %2304 }
0x10b7   : > { %v2309_v1 = vmul.f32 0.35355338, %v2305_v44 }
0x10f6   : > { %v2316_v46 = vpop.xlane.xlu1 %2315 }
0x10f7   : > { %v2318_v48 = vmax.f32 %v2316_v46, %v2310_v45 }
0x10f9   : > { %v2320_v49 = vsub.f32 %v2296_v35, %v2318_v48  ;;  %v2326_v50 = vsub.f32 %v2310_v45, %v2318_v48 }
0x10fb   : > { %v2323_v54 = vmul.f32 1.442695, %v2320_v49  ;;  %v2329_v0 = vmul.f32 1.442695, %v2326_v50 }
0x10fd   : > { %3182 = vpow2.f32 %v2323_v54 }
0x10fe   : > { %3184 = vpow2.f32 %v2329_v0 }
0x1100   : > { %v3646_v55 = vpop.f32.mrb[18].mxu0 }
0x1101   : > { %v2971_v9 = vpop.f32.mrb[19].mxu0 }
0x1104   : > { %v2213_v56 = vpop.f32.mrb[20].mxu0 }
0x1105   : > { %v2295_v57 = vmul.f32 0.35355338, %v2213_v56  ;;  %v2976_v59 = vpop.f32.mrb[21].mxu0 }
0x1107   : > { %v3183_v60 = vpop.eup %3182  ;;  %v2311_v61 = vsel %vm638_vm13, %v2295_v57, -inf }
0x1108   : > { %2312 = vmax.xlane.f32.xlu0 %v2311_v61  ;;  %v2334_v62 = vsel %vm638_vm13, %v3183_v60, 0.0  ;;  %v3185_v4 = vpop.eup %3184 }
0x1109   : > { %2335 = vadd.xlane.f32.xlu1 %v2334_v62 }
0x111a   : > { %2426 = vrot.lane.b32.xlu1 %v3367_v18, %s3250_s26  ;;  %v1233_v18 = vmul.f32 %v3515_v53, %v3400_v43 }
0x111e   : > { %1393 = vrot.lane.b32.xlu1 %v3528_v7, %s3249_s25 }
0x1122   : > { %1949 = vrot.lane.b32.xlu1 %v3603_v22, %s3247_s23 }
0x1195   : > { %v2313_v2 = vpop.xlane.xlu0 %2312 }
0x1196   : > { %v2317_v5 = vmax.f32 %v2313_v2, %v2309_v1  ;;  %v2336_v6 = vpop.xlane.xlu1 %2335  ;;  %v2551_v2 = vld [vmem:[#allocation2 + $0x8] sm:$0xff] }
0x1197   : > { %v2338_v10 = vadd.f32 %v3185_v4, %v2336_v6 }
0x1198   : > { %v2319_v13 = vsub.f32 %v2295_v57, %v2317_v5  ;;  %v2325_v3 = vsub.f32 %v2309_v1, %v2317_v5  ;;  %v674_v57 = vmul.f32 %v3470_v63, %v3400_v43  ;;  %v2550_v1 = vld [vmem:[#allocation2] sm:$0xff] }
0x1199   : > { %3186 = vrcp.f32 %v2338_v10  ;;  %v3043_v6 = vpack.c.bf16 %v2551_v2, %v2550_v1  ;;  %v2553_v10 = vld [vmem:[#allocation2 + $0x18] sm:$0xff] }
0x119a   : > { %v2321_v14 = vmul.f32 1.442695, %v2319_v13  ;;  %v2427_v16 = vpop.permute.xlu1 %2426  ;;  %v2327_v53 = vmul.f32 1.442695, %v2325_v3 }
0x119b   : > { %2988 = vmatpush3.msk.msra.mxu1 %vm683_vm14, %v2427_v16 }
0x119c   : > { %3188 = vpow2.f32 %v2321_v14 }
0x119d   : > { %3190 = vpow2.f32 %v2327_v53 }
0x119e   : > { %v1394_v7 = vpop.permute.xlu1 %1393 }
0x119f   : > { %v1399_v22 = vadd.f32 %v1394_v7, %v1233_v18 }
0x11a3   : > { %v3187_v19 = vpop.eup %3186 }
0x11a4   : > { %v2348_v21 = vmul.f32 %v3187_v19, %v3183_v60  ;;  %v2344_v23 = vmul.f32 %v3187_v19, %v3185_v4  ;;  %v673_v60 = vmul.f32 %v3443_v20, %v3400_v43  ;;  %v2552_v4 = vld [vmem:[#allocation2 + $0x10] sm:$0xff] }
0x11a5   : > { %v3047_v3 = vpack.c.bf16 %v2553_v10, %v2552_v4 }
0x11a6   : > { %v3189_v24 = vpop.eup %3188  ;;  %2990 = vmatmul.mubr.msk.f32.vlgmr.msra.gmra.mrb[24].mxu1 %vm679_vm15, %v2348_v21  ;;  %v2346_v49 = vmul.f32 %v2344_v23, %v3400_v43 }
0x11a7   : > { %v2331_v25 = vsel %vm638_vm13, %v3189_v24, 0.0  ;;  %v3191_v26 = vpop.eup %3190 }
0x11a8   : > { %2332 = vadd.xlane.f32.xlu0 %v2331_v25 }
0x11be   : > { %2349 = vrot.lane.b32.xlu0 %v3395_v42, %s3250_s26  ;;  %v1950_v42 = vpop.permute.xlu1 %1949 }
0x11c2   : > { %1395 = vrot.lane.b32.xlu0 %v3569_v52, %s3249_s25  ;;  %v1789_v52 = vmul.f32 %v3592_v37, %v3400_v43 }
0x11c4   : > { %v1955_v11 = vadd.f32 %v1950_v42, %v1789_v52 }
0x11c6   : > { %1951 = vrot.lane.b32.xlu0 %v1943_v38, %s3247_s23 }
0x1235   : > { %v2333_v12 = vpop.xlane.xlu0 %2332 }
0x1236   : > { %v2337_v28 = vadd.f32 %v3191_v26, %v2333_v12 }
0x1238   : > { %3192 = vrcp.f32 %v2337_v28 }
0x1239   : > { %v2350_v29 = vpop.permute.xlu0 %2349 }
0x123a   : > { %2983 = vmatpush3.msk.msra.mxu0 %vm683_vm14, %v2350_v29 }
0x123b   : > { %3044 = vmatprep.subr.bf16.mxu0 %v3043_v6 }
0x123d   : > { %v1396_v27 = vpop.permute.xlu0 %1395 }
0x123e   : > { %v1400_v32 = vadd.f32 %v1396_v27, %v1234_v31 }
0x1240   : > { %v1403_v33 = vcombine.low %v1399_v22, %v1400_v32 }
0x1241   : > { %v1952_v47 = vpop.permute.xlu0 %1951 }
0x1242   : > { %v3193_v35 = vpop.eup %3192  ;;  %v1956_v38 = vadd.f32 %v1952_v47, %v1790_v34  ;;  %v1404_v46 = vrot.slane %v1403_v33, 7 }
0x1243   : > { %v2347_v39 = vmul.f32 %v3193_v35, %v3189_v24  ;;  %v2343_v40 = vmul.f32 %v3193_v35, %v3191_v26 }
0x1244   : > { %v1959_v41 = vcombine.low %v1955_v11, %v1956_v38 }
0x1245   : > { %2985 = vmatmul.mubr.msk.f32.vlgmr.msra.gmra.mrb[22].mxu0 %vm679_vm15, %v2347_v39  ;;  %v2345_v50 = vmul.f32 %v2343_v40, %v3400_v43 }
0x1246   : > { %v1960_v37 = vrot.slane %v1959_v41, 7  ;;  %3046 = vmatpush3.bf16.msra.mxu0 %v3043_v6 }
0x1247   : > { %3048 = vmatprep.subr.bf16.mxu0 %v3047_v3 }
0x124a   : > { %3050 = vmatpush3.bf16.msra.mxu0 %v3047_v3 }
0x1279   : > { %v2499_v30 = vpop.f32.mrb[24].mxu1 }
0x127a   : > { %2507 = vrot.lane.b32.xlu0 %v2499_v30, %s3243_s19  ;;  %v2991_v44 = vpop.f32.mrb[25].mxu1 }
0x127e   : > { %837 = vrot.lane.b32.xlu0 %v3493_v15, %s3240_s17 }
0x1282   : > { %1961 = vrot.lane.b32.xlu0 %v1960_v37, %s3248_s24 }
0x12ec   : > { %v2508_v48 = vpop.permute.xlu0 %2507 }
0x12ed   : > { %v2512_v15 = vadd.f32 %v2508_v48, %v2346_v49 }
0x12f0   : > { %v838_v56 = vpop.permute.xlu0 %837 }
0x12f1   : > { %v842_v61 = vadd.f32 %v838_v56, %v674_v57 }
0x12f4   : > { %v1962_v43 = vpop.permute.xlu0 %1961 }
0x12f5   : > { %v1964_v20 = vsel %vm379_vm7, %v3576_v58, %v1962_v43 }
0x1318   : > { %v2422_v8 = vpop.f32.mrb[22].mxu0 }
0x1319   : > { %v2986_v45 = vpop.f32.mrb[23].mxu0  ;;  %2505 = vrot.lane.b32.xlu1 %v2422_v8, %s3243_s19 }
0x131d   : > { %835 = vrot.lane.b32.xlu1 %v3461_v36, %s3240_s17 }
0x1321   : > { %1405 = vrot.lane.b32.xlu1 %v1404_v46, %s3245_s21 }
0x138b   : > { %v2506_v54 = vpop.permute.xlu1 %2505 }
0x138c   : > { %v2511_v9 = vadd.f32 %v2506_v54, %v2345_v50 }
0x138e   : > { %v2515_v59 = vcombine.low %v2511_v9, %v2512_v15 }
0x138f   : > { %v836_v36 = vpop.permute.xlu1 %835 }
0x1390   : > { %v2516_v62 = vrot.slane %v2515_v59, 7  ;;  %v841_v0 = vadd.f32 %v836_v36, %v673_v60 }
0x1392   : > { %v845_v5 = vcombine.low %v841_v0, %v842_v61  ;;  %2517 = vrot.lane.b32.xlu1 %v2516_v62, %s3250_s26 }
0x1393   : > { %v1406_v13 = vpop.permute.xlu1 %1405 }
0x1394   : > { %v846_v14 = vrot.slane %v845_v5, 7  ;;  %v1408_v63 = vsel %vm379_vm7, %v3495_v17, %v1406_v13 }
0x1396   : > { %2522 = vrot.lane.b32.xlu1 %v1408_v63, %s3252_s28  ;;  %847 = vrot.lane.b32.xlu0 %v846_v14, %s3240_s17 }
0x139a   : > { %2524 = vrot.lane.b32.xlu0 %v1406_v13, %s3252_s28  ;;  %2529 = vrot.lane.b32.xlu1 %v1964_v20, %s3253_s29 }
0x139e   : > { %2531 = vrot.lane.b32.xlu0 %v1962_v43, %s3253_s29 }
0x1404   : > { %v2518_v16 = vpop.permute.xlu1 %2517 }
0x1405   : > { %2538 = vrot.lane.b32.xlu0 %v2518_v16, %s3254_s4  ;;  %v2520_v17 = vsel %vm379_vm7, %v3646_v55, %v2518_v16 }
0x1406   : > { %2536 = vrot.lane.b32.xlu1 %v2520_v17, %s3254_s4 }
0x1408   : > { %v848_v18 = vpop.permute.xlu0 %847  ;;  %v2523_v22 = vpop.permute.xlu1 %2522 }
0x1409   : > { %v850_v58 = vsel %vm379_vm7, %v3420_v51, %v848_v18 }
0x140a   : > { %v2542_v23 = vsel %vm280_vm5, %v850_v58, %v2523_v22 }
0x140c   : > { %v2525_v7 = vpop.permute.xlu0 %2524  ;;  %v2530_v21 = vpop.permute.xlu1 %2529 }
0x140d   : > { %v2545_v25 = vsel %vm2544_vm1, %v2542_v23, %v2530_v21  ;;  %v2543_v53 = vsel %vm280_vm5, %v848_v18, %v2525_v7 }
0x1410   : > { %v2532_v19 = vpop.permute.xlu0 %2531 }
0x1411   : > { %v2546_v55 = vsel %vm2544_vm1, %v2543_v53, %v2532_v19 }
0x1477   : > { %v2539_v24 = vpop.permute.xlu0 %2538 }
0x1478   : > { %v2537_v26 = vpop.permute.xlu1 %2536  ;;  %v2549_v28 = vsel %vm2547_vm2, %v2546_v55, %v2539_v24 }
0x1479   : > { %v2548_v12 = vsel %vm2547_vm2, %v2545_v25, %v2537_v26 }
0x147a   : > { %3000 = vmatprep.mubr.msk.f32.mxu0 %vm192_vm0, %v2548_v12 }
0x147b   : > { %3001 = vmatmul.mubr.msk.f32.vlgmr.msra.gmra.mrb[24].mxu0 %vm192_vm0, %v2549_v28 }
0x154e   : > { %v3002_v51 = vpop.f32.mrb[24].mxu0 }
0x154f   : > { %2637 = vst.msk [vmem:[%s185_s7 + $0x8] sm:$0x1] %vm2636_vm3, %v3002_v51  ;;  %v2626_v29 = vpop.f32.mrb[25].mxu0 }
0x1550   : > { %2635 = vst.msk [vmem:[%s185_s7] sm:$0xff] %vm192_vm0, %v2626_v29 }
0x1551 PF: > { %s14_s12 = sadd.s32 1, %s3232_s12  }
0x1552   : > { %p11_p3 = scmp.ge.s32.totalorder %s14_s12, 4  }
0x1554   :  { %13 = sbr.rel (!%p11_p3) target bundleno = 1 (0x1), region = 67 }
0x155b   :  { %2659 = vsyncpa [#allocation3], 1 }
0x155c   :  { %2661 = vsyncpa [#allocation3 + $0x1], 1 }

</bundles_post_ra>
